<compile_context>
chip_gen: v7x
topology: tpu7x:2x2x1
jax: 0.10.0
libtpu: 0.0.40
codegen_flags: <defaults>
</compile_context>

<pallas_src>
import functools
import math

import jax
import jax.numpy as jnp
from jax.experimental import pallas as pl
from jax.experimental.pallas import tpu as pltpu


PARAM_ORDER = ("wq", "bq", "wk", "bk", "wv", "bv", "wo", "bo",
               "g1", "be1", "w1", "b1", "w2", "b2", "g2", "be2")


# ---------------------------------------------------------------------------
# Fused kernel: embedding (+PE) at layer 0, then one EncoderBlock per grid step
# ---------------------------------------------------------------------------
def encoder_kernel(ids_ref,                      # SMEM (B, S) int32 (scalar prefetch)
                   table_ref, pe_ref,            # (V, D), (S, D)
                   wq_ref, bq_ref, wk_ref, bk_ref, wv_ref, bv_ref,
                   wo_ref, bo_ref, g1_ref, be1_ref,
                   w1_ref, b1_ref, w2_ref, b2_ref, g2_ref, be2_ref,
                   out_ref,                      # (1, S, D) resident per batch
                   *, num_heads, head_dim, d_model, seq_len, vocab, eps):
    b = pl.program_id(0)      # batch element  ("parallel")
    l = pl.program_id(1)      # encoder layer  ("arbitrary", sequential carry)
    f32 = jnp.float32

    # ---- layer 0 only: gather embedding rows, scale by sqrt(D), add PE ------
    @pl.when(l == 0)
    def _embed():
        scale = jnp.float32(math.sqrt(d_model))
        rows = []
        for i in range(seq_len):                      # static unroll (S small)
            tok = jnp.clip(ids_ref[b, i], 0, vocab - 1)   # clamp out-of-range ids
            rows.append(table_ref[pl.ds(tok, 1), :])      # (1, D) dynamic row
        emb = jnp.concatenate(rows, axis=0)               # (S, D)
        out_ref[0] = emb * scale + pe_ref[...]

    x = out_ref[0]                                         # (S, D) resident activation

    # ---- multi-head self-attention: all heads as batched (leading-axis) matmuls
    # TODO(synk): optional attention mask (masked_fill with -inf) not wired in.
    xb = jnp.broadcast_to(x, (num_heads, seq_len, d_model))          # (H, S, D)
    q = jnp.einsum('hsd,hde->hse', xb, wq_ref[0],
                   preferred_element_type=f32) + bq_ref[0]           # (H, S, hd)
    k = jnp.einsum('hsd,hde->hse', xb, wk_ref[0],
                   preferred_element_type=f32) + bk_ref[0]
    v = jnp.einsum('hsd,hde->hse', xb, wv_ref[0],
                   preferred_element_type=f32) + bv_ref[0]

    scores = jnp.einsum('hqe,hke->hqk', q, k, preferred_element_type=f32)
    scores = scores * jnp.float32(1.0 / math.sqrt(head_dim))
    scores = scores - jnp.max(scores, axis=-1, keepdims=True)
    p = jnp.exp(scores)
    probs = p * pl.reciprocal(jnp.sum(p, axis=-1, keepdims=True), approx=True)
    ctx = jnp.einsum('hqk,hke->hqe', probs, v, preferred_element_type=f32)  # (H,S,hd)
    # Output projection with head-split Wo: batched matmul then sum over heads
    attn_out = jnp.einsum('hqe,hed->hqd', ctx, wo_ref[0],
                          preferred_element_type=f32).sum(axis=0) + bo_ref[0]  # (S, D)

    # ---- LayerNormalization matching the PyTorch class ----------------------
    def layer_norm(y, gamma, beta):
        mean = jnp.mean(y, axis=-1, keepdims=True)
        var = jnp.sum((y - mean) ** 2, axis=-1, keepdims=True) / (d_model - 1)
        std = jnp.sqrt(var)                               # unbiased std (torch default)
        return gamma * (y - mean) * pl.reciprocal(std + eps, approx=True) + beta

    # residual / attention dropout are identity in eval mode
    y1 = layer_norm(x + attn_out, g1_ref[0], be1_ref[0])

    # ---- feed forward --------------------------------------------------------
    h1 = jnp.maximum(jnp.dot(y1, w1_ref[0], preferred_element_type=f32) + b1_ref[0], 0.0)
    ff = jnp.dot(h1, w2_ref[0], preferred_element_type=f32) + b2_ref[0]
    y2 = layer_norm(y1 + ff, g2_ref[0], be2_ref[0])

    out_ref[0] = y2                                        # stays resident until b changes


# ---------------------------------------------------------------------------
# Wrapper: one pallas_call for the whole encoder stack
# ---------------------------------------------------------------------------
def encoder_forward(token_ids, emb_table, pe, stacked_params, num_heads):
    B, S = token_ids.shape
    V, D = emb_table.shape
    L = stacked_params["wq"].shape[0]
    assert D % num_heads == 0
    hd = D // num_heads
    pe_s = pe[:S]

    kernel = functools.partial(
        encoder_kernel, num_heads=num_heads, head_dim=hd,
        d_model=D, seq_len=S, vocab=V, eps=1e-6)

    layer_args = [stacked_params[n] for n in PARAM_ORDER]

    def const_spec(arr):                  # whole array, constant block index
        nd = arr.ndim
        return pl.BlockSpec(arr.shape, lambda bi, li, ids, _nd=nd: (0,) * _nd)

    def layer_spec(arr):                  # one layer slab per 'l' grid index
        rest = arr.ndim - 1
        return pl.BlockSpec((1,) + arr.shape[1:],
                            lambda bi, li, ids, _r=rest: (li,) + (0,) * _r)

    in_specs = [const_spec(emb_table), const_spec(pe_s)]
    in_specs += [layer_spec(a) for a in layer_args]

    grid_spec = pltpu.PrefetchScalarGridSpec(
        num_scalar_prefetch=1,            # token ids -> SMEM
        grid=(B, L),                      # batch (parallel) x layer (sequential)
        in_specs=in_specs,
        out_specs=pl.BlockSpec((1, S, D), lambda bi, li, ids: (bi, 0, 0)),
    )

    return pl.pallas_call(
        kernel,
        out_shape=jax.ShapeDtypeStruct((B, S, D), jnp.float32),
        grid_spec=grid_spec,
        compiler_params=pltpu.CompilerParams(
            dimension_semantics=("parallel", "arbitrary")),
    )(token_ids.astype(jnp.int32), emb_table, pe_s, *layer_args)


# ---------------------------------------------------------------------------
# Deterministic parameter construction (synthetic, not a checkpoint)
# ---------------------------------------------------------------------------
def positional_encoding(max_seq_len, d_model):
    pos = jnp.arange(max_seq_len, dtype=jnp.float32)[:, None]
    div = jnp.exp(jnp.arange(0, d_model, 2, dtype=jnp.float32)
                  * (-(math.log(10000.0) / d_model)))
    pe = jnp.zeros((max_seq_len, d_model), jnp.float32)
    pe = pe.at[:, 0::2].set(jnp.sin(pos * div))
    pe = pe.at[:, 1::2].set(jnp.cos(pos * div))
    return pe


def init_block_params(key, d_model, hidden_dim, num_heads):
    hd = d_model // num_heads
    ks = jax.random.split(key, 6)
    w = lambda k, shape: 0.02 * jax.random.normal(k, shape, jnp.float32)
    # Host-side per-head split of the (D, D) projection matrices so the kernel
    # runs one batched matmul over heads instead of slicing the lane axis.
    #   Wq/Wk/Wv: (D, D) -> (H, D, hd) ;  Wo: (D, D) -> (H, hd, D)
    split_in = lambda m: jnp.transpose(m.reshape(d_model, num_heads, hd), (1, 0, 2))
    wq = split_in(w(ks[0], (d_model, d_model)))
    wk = split_in(w(ks[1], (d_model, d_model)))
    wv = split_in(w(ks[2], (d_model, d_model)))
    wo = w(ks[3], (d_model, d_model)).reshape(num_heads, hd, d_model)
    return dict(
        wq=wq, bq=jnp.zeros((num_heads, 1, hd), jnp.float32),
        wk=wk, bk=jnp.zeros((num_heads, 1, hd), jnp.float32),
        wv=wv, bv=jnp.zeros((num_heads, 1, hd), jnp.float32),
        wo=wo, bo=jnp.zeros((1, d_model), jnp.float32),
        g1=jnp.ones((1, d_model), jnp.float32), be1=jnp.zeros((1, d_model), jnp.float32),
        w1=w(ks[4], (d_model, hidden_dim)), b1=jnp.zeros((1, hidden_dim), jnp.float32),
        w2=w(ks[5], (hidden_dim, d_model)), b2=jnp.zeros((1, d_model), jnp.float32),
        g2=jnp.ones((1, d_model), jnp.float32), be2=jnp.zeros((1, d_model), jnp.float32),
    )


def stack_layer_params(block_params):
    return {n: jnp.stack([p[n] for p in block_params], axis=0)
            for n in block_params[0].keys()}


if __name__ == "__main__":
    # Small shapes consistent with the module: B=2, S=8, D=32, heads=4, hidden=64
    B, S, D, H, HID = 2, 8, 32, 4, 64
    VOCAB, MAX_SEQ, NUM_BLOCKS = 64, 64, 2

    key = jax.random.PRNGKey(0)
    k_tok, k_emb, k_blk = jax.random.split(key, 3)

    token_ids = jax.random.randint(k_tok, (B, S), 0, VOCAB, dtype=jnp.int32)
    emb_table = jax.random.normal(k_emb, (VOCAB, D), jnp.float32)
    pe = positional_encoding(MAX_SEQ, D)
    block_params = [init_block_params(jax.random.fold_in(k_blk, i), D, HID, H)
                    for i in range(NUM_BLOCKS)]
    stacked = stack_layer_params(block_params)

    out = encoder_forward(token_ids, emb_table, pe, stacked, H)
    out = jax.block_until_ready(out)

    assert out.shape == (B, S, D), out.shape
    assert bool(jnp.all(jnp.isfinite(out)))
    print("KERNEL_OK")
</pallas_src>

<mosaic_0001>
module attributes {stable_mosaic.version = 11 : i64} {
  func.func @encoder_kernel(%arg0: i32, %arg1: i32, %arg2: memref<2x8xi32, #tpu.memory_space<smem>>, %arg3: memref<64x32xf32, #tpu.memory_space<vmem>>, %arg4: memref<8x32xf32, #tpu.memory_space<vmem>>, %arg5: memref<1x4x32x8xf32, #tpu.memory_space<vmem>>, %arg6: memref<1x4x1x8xf32, #tpu.memory_space<vmem>>, %arg7: memref<1x4x32x8xf32, #tpu.memory_space<vmem>>, %arg8: memref<1x4x1x8xf32, #tpu.memory_space<vmem>>, %arg9: memref<1x4x32x8xf32, #tpu.memory_space<vmem>>, %arg10: memref<1x4x1x8xf32, #tpu.memory_space<vmem>>, %arg11: memref<1x4x8x32xf32, #tpu.memory_space<vmem>>, %arg12: memref<1x1x32xf32, #tpu.memory_space<vmem>>, %arg13: memref<1x1x32xf32, #tpu.memory_space<vmem>>, %arg14: memref<1x1x32xf32, #tpu.memory_space<vmem>>, %arg15: memref<1x32x64xf32, #tpu.memory_space<vmem>>, %arg16: memref<1x1x64xf32, #tpu.memory_space<vmem>>, %arg17: memref<1x64x32xf32, #tpu.memory_space<vmem>>, %arg18: memref<1x1x32xf32, #tpu.memory_space<vmem>>, %arg19: memref<1x1x32xf32, #tpu.memory_space<vmem>>, %arg20: memref<1x1x32xf32, #tpu.memory_space<vmem>>, %arg21: memref<1x8x32xf32, #tpu.memory_space<vmem>>) attributes {dimension_semantics = [#tpu.dimension_semantics<parallel>, #tpu.dimension_semantics<arbitrary>], iteration_bounds = array<i64: 2, 2>, scalar_prefetch = 1 : i64, scratch_operands = 0 : i64, tpu.core_type = #tpu.core_type<tc>, window_params = [{pipeline_mode = #tpu.pipeline_mode<synchronous>, transform_indices = @transform_0, window_bounds = array<i64: 64, 32>}, {pipeline_mode = #tpu.pipeline_mode<synchronous>, transform_indices = @transform_1, window_bounds = array<i64: 8, 32>}, {transform_indices = @transform_2, window_bounds = array<i64: 1, 4, 32, 8>}, {transform_indices = @transform_3, window_bounds = array<i64: 1, 4, 1, 8>}, {transform_indices = @transform_4, window_bounds = array<i64: 1, 4, 32, 8>}, {transform_indices = @transform_5, window_bounds = array<i64: 1, 4, 1, 8>}, {transform_indices = @transform_6, window_bounds = array<i64: 1, 4, 32, 8>}, {transform_indices = @transform_7, window_bounds = array<i64: 1, 4, 1, 8>}, {transform_indices = @transform_8, window_bounds = array<i64: 1, 4, 8, 32>}, {transform_indices = @transform_9, window_bounds = array<i64: 1, 1, 32>}, {transform_indices = @transform_10, window_bounds = array<i64: 1, 1, 32>}, {transform_indices = @transform_11, window_bounds = array<i64: 1, 1, 32>}, {transform_indices = @transform_12, window_bounds = array<i64: 1, 32, 64>}, {transform_indices = @transform_13, window_bounds = array<i64: 1, 1, 64>}, {transform_indices = @transform_14, window_bounds = array<i64: 1, 64, 32>}, {transform_indices = @transform_15, window_bounds = array<i64: 1, 1, 32>}, {transform_indices = @transform_16, window_bounds = array<i64: 1, 1, 32>}, {transform_indices = @transform_17, window_bounds = array<i64: 1, 1, 32>}, {transform_indices = @transform_18, window_bounds = array<i64: 1, 8, 32>}]} {
    %c0_i32 = arith.constant 0 : i32
    %0 = arith.cmpi eq, %arg1, %c0_i32 : i32
    %1 = arith.extui %0 : i1 to i32
    %c0_i32_0 = arith.constant 0 : i32
    %2 = arith.cmpi ne, %1, %c0_i32_0 : i32
    scf.if %2 {
      %125 = arith.index_cast %arg0 : i32 to index
      %c0_83 = arith.constant 0 : index
      %126 = memref.load %arg2[%125, %c0_83] : memref<2x8xi32, #tpu.memory_space<smem>>
      %c0_i32_84 = arith.constant 0 : i32
      %c63_i32 = arith.constant 63 : i32
      %127 = arith.maxsi %c0_i32_84, %126 : i32
      %128 = arith.minsi %c63_i32, %127 : i32
      %129 = arith.index_cast %128 : i32 to index
      %c0_85 = arith.constant 0 : index
      %130 = vector.load %arg3[%129, %c0_85] : memref<64x32xf32, #tpu.memory_space<vmem>>, vector<1x32xf32>
      %131 = arith.index_cast %arg0 : i32 to index
      %c1 = arith.constant 1 : index
      %132 = memref.load %arg2[%131, %c1] : memref<2x8xi32, #tpu.memory_space<smem>>
      %c0_i32_86 = arith.constant 0 : i32
      %c63_i32_87 = arith.constant 63 : i32
      %133 = arith.maxsi %c0_i32_86, %132 : i32
      %134 = arith.minsi %c63_i32_87, %133 : i32
      %135 = arith.index_cast %134 : i32 to index
      %c0_88 = arith.constant 0 : index
      %136 = vector.load %arg3[%135, %c0_88] : memref<64x32xf32, #tpu.memory_space<vmem>>, vector<1x32xf32>
      %137 = arith.index_cast %arg0 : i32 to index
      %c2 = arith.constant 2 : index
      %138 = memref.load %arg2[%137, %c2] : memref<2x8xi32, #tpu.memory_space<smem>>
      %c0_i32_89 = arith.constant 0 : i32
      %c63_i32_90 = arith.constant 63 : i32
      %139 = arith.maxsi %c0_i32_89, %138 : i32
      %140 = arith.minsi %c63_i32_90, %139 : i32
      %141 = arith.index_cast %140 : i32 to index
      %c0_91 = arith.constant 0 : index
      %142 = vector.load %arg3[%141, %c0_91] : memref<64x32xf32, #tpu.memory_space<vmem>>, vector<1x32xf32>
      %143 = arith.index_cast %arg0 : i32 to index
      %c3 = arith.constant 3 : index
      %144 = memref.load %arg2[%143, %c3] : memref<2x8xi32, #tpu.memory_space<smem>>
      %c0_i32_92 = arith.constant 0 : i32
      %c63_i32_93 = arith.constant 63 : i32
      %145 = arith.maxsi %c0_i32_92, %144 : i32
      %146 = arith.minsi %c63_i32_93, %145 : i32
      %147 = arith.index_cast %146 : i32 to index
      %c0_94 = arith.constant 0 : index
      %148 = vector.load %arg3[%147, %c0_94] : memref<64x32xf32, #tpu.memory_space<vmem>>, vector<1x32xf32>
      %149 = arith.index_cast %arg0 : i32 to index
      %c4 = arith.constant 4 : index
      %150 = memref.load %arg2[%149, %c4] : memref<2x8xi32, #tpu.memory_space<smem>>
      %c0_i32_95 = arith.constant 0 : i32
      %c63_i32_96 = arith.constant 63 : i32
      %151 = arith.maxsi %c0_i32_95, %150 : i32
      %152 = arith.minsi %c63_i32_96, %151 : i32
      %153 = arith.index_cast %152 : i32 to index
      %c0_97 = arith.constant 0 : index
      %154 = vector.load %arg3[%153, %c0_97] : memref<64x32xf32, #tpu.memory_space<vmem>>, vector<1x32xf32>
      %155 = arith.index_cast %arg0 : i32 to index
      %c5 = arith.constant 5 : index
      %156 = memref.load %arg2[%155, %c5] : memref<2x8xi32, #tpu.memory_space<smem>>
      %c0_i32_98 = arith.constant 0 : i32
      %c63_i32_99 = arith.constant 63 : i32
      %157 = arith.maxsi %c0_i32_98, %156 : i32
      %158 = arith.minsi %c63_i32_99, %157 : i32
      %159 = arith.index_cast %158 : i32 to index
      %c0_100 = arith.constant 0 : index
      %160 = vector.load %arg3[%159, %c0_100] : memref<64x32xf32, #tpu.memory_space<vmem>>, vector<1x32xf32>
      %161 = arith.index_cast %arg0 : i32 to index
      %c6 = arith.constant 6 : index
      %162 = memref.load %arg2[%161, %c6] : memref<2x8xi32, #tpu.memory_space<smem>>
      %c0_i32_101 = arith.constant 0 : i32
      %c63_i32_102 = arith.constant 63 : i32
      %163 = arith.maxsi %c0_i32_101, %162 : i32
      %164 = arith.minsi %c63_i32_102, %163 : i32
      %165 = arith.index_cast %164 : i32 to index
      %c0_103 = arith.constant 0 : index
      %166 = vector.load %arg3[%165, %c0_103] : memref<64x32xf32, #tpu.memory_space<vmem>>, vector<1x32xf32>
      %167 = arith.index_cast %arg0 : i32 to index
      %c7 = arith.constant 7 : index
      %168 = memref.load %arg2[%167, %c7] : memref<2x8xi32, #tpu.memory_space<smem>>
      %c0_i32_104 = arith.constant 0 : i32
      %c63_i32_105 = arith.constant 63 : i32
      %169 = arith.maxsi %c0_i32_104, %168 : i32
      %170 = arith.minsi %c63_i32_105, %169 : i32
      %171 = arith.index_cast %170 : i32 to index
      %c0_106 = arith.constant 0 : index
      %172 = vector.load %arg3[%171, %c0_106] : memref<64x32xf32, #tpu.memory_space<vmem>>, vector<1x32xf32>
      %173 = tpu.concatenate %130, %136, %142, %148, %154, %160, %166, %172 in 0 : vector<1x32xf32>, vector<1x32xf32>, vector<1x32xf32>, vector<1x32xf32>, vector<1x32xf32>, vector<1x32xf32>, vector<1x32xf32>, vector<1x32xf32> -> vector<8x32xf32>
      %cst_107 = arith.constant 5.65685415 : f32
      %174 = vector.broadcast %cst_107 : f32 to vector<8x32xf32>
      %175 = arith.mulf %173, %174 : vector<8x32xf32>
      %c0_108 = arith.constant 0 : index
      %c0_109 = arith.constant 0 : index
      %176 = vector.load %arg4[%c0_108, %c0_109] : memref<8x32xf32, #tpu.memory_space<vmem>>, vector<8x32xf32>
      %177 = arith.addf %175, %176 : vector<8x32xf32>
      %c0_110 = arith.constant 0 : index
      %c0_111 = arith.constant 0 : index
      %c0_112 = arith.constant 0 : index
      %178 = vector.load %arg21[%c0_110, %c0_111, %c0_112] : memref<1x8x32xf32, #tpu.memory_space<vmem>>, vector<1x8x32xf32>
      %179 = vector.shape_cast %178 : vector<1x8x32xf32> to vector<8x32xf32>
      %180 = vector.shape_cast %177 : vector<8x32xf32> to vector<1x8x32xf32>
      tpu.vector_store %arg21[%c0_110, %c0_111, %c0_112], %180 {strides = array<i32>} : memref<1x8x32xf32, #tpu.memory_space<vmem>>, vector<1x8x32xf32>,
    } else {
    }
    %c0 = arith.constant 0 : index
    %c0_1 = arith.constant 0 : index
    %c0_2 = arith.constant 0 : index
    %3 = vector.load %arg21[%c0, %c0_1, %c0_2] : memref<1x8x32xf32, #tpu.memory_space<vmem>>, vector<1x8x32xf32>
    %4 = vector.shape_cast %3 : vector<1x8x32xf32> to vector<8x32xf32>
    %5 = vector.shape_cast %4 : vector<8x32xf32> to vector<1x8x32xf32>
    %6 = vector.broadcast %5 : vector<1x8x32xf32> to vector<4x8x32xf32>
    %c0_3 = arith.constant 0 : index
    %c0_4 = arith.constant 0 : index
    %c0_5 = arith.constant 0 : index
    %c0_6 = arith.constant 0 : index
    %7 = vector.load %arg5[%c0_3, %c0_4, %c0_5, %c0_6] : memref<1x4x32x8xf32, #tpu.memory_space<vmem>>, vector<1x4x32x8xf32>
    %8 = vector.shape_cast %7 : vector<1x4x32x8xf32> to vector<4x32x8xf32>
    "tpu.trace_start"() <{level = 10 : i32, message = "hsd,hde->hse"}> : () -> ()
    %cst = arith.constant dense<0.000000e+00> : vector<4x8x8xf32>
    %9 = tpu.matmul %6, %8, %cst {dimension_numbers = #tpu.dot_dimension_numbers<[2], [1], [1], [2], [0, 0, 0, 1, 1, 2], [0], [0]>} : vector<4x8x32xf32>, vector<4x32x8xf32>, vector<4x8x8xf32> -> vector<4x8x8xf32>
    "tpu.trace_stop"() : () -> ()
    %c0_7 = arith.constant 0 : index
    %c0_8 = arith.constant 0 : index
    %c0_9 = arith.constant 0 : index
    %c0_10 = arith.constant 0 : index
    %10 = vector.load %arg6[%c0_7, %c0_8, %c0_9, %c0_10] : memref<1x4x1x8xf32, #tpu.memory_space<vmem>>, vector<1x4x1x8xf32>
    %11 = vector.shape_cast %10 : vector<1x4x1x8xf32> to vector<4x1x8xf32>
    %12 = vector.broadcast %11 : vector<4x1x8xf32> to vector<4x8x8xf32>
    %13 = arith.addf %9, %12 : vector<4x8x8xf32>
    %c0_11 = arith.constant 0 : index
    %c0_12 = arith.constant 0 : index
    %c0_13 = arith.constant 0 : index
    %c0_14 = arith.constant 0 : index
    %14 = vector.load %arg7[%c0_11, %c0_12, %c0_13, %c0_14] : memref<1x4x32x8xf32, #tpu.memory_space<vmem>>, vector<1x4x32x8xf32>
    %15 = vector.shape_cast %14 : vector<1x4x32x8xf32> to vector<4x32x8xf32>
    "tpu.trace_start"() <{level = 10 : i32, message = "hsd,hde->hse"}> : () -> ()
    %cst_15 = arith.constant dense<0.000000e+00> : vector<4x8x8xf32>
    %16 = tpu.matmul %6, %15, %cst_15 {dimension_numbers = #tpu.dot_dimension_numbers<[2], [1], [1], [2], [0, 0, 0, 1, 1, 2], [0], [0]>} : vector<4x8x32xf32>, vector<4x32x8xf32>, vector<4x8x8xf32> -> vector<4x8x8xf32>
    "tpu.trace_stop"() : () -> ()
    %c0_16 = arith.constant 0 : index
    %c0_17 = arith.constant 0 : index
    %c0_18 = arith.constant 0 : index
    %c0_19 = arith.constant 0 : index
    %17 = vector.load %arg8[%c0_16, %c0_17, %c0_18, %c0_19] : memref<1x4x1x8xf32, #tpu.memory_space<vmem>>, vector<1x4x1x8xf32>
    %18 = vector.shape_cast %17 : vector<1x4x1x8xf32> to vector<4x1x8xf32>
    %19 = vector.broadcast %18 : vector<4x1x8xf32> to vector<4x8x8xf32>
    %20 = arith.addf %16, %19 : vector<4x8x8xf32>
    %c0_20 = arith.constant 0 : index
    %c0_21 = arith.constant 0 : index
    %c0_22 = arith.constant 0 : index
    %c0_23 = arith.constant 0 : index
    %21 = vector.load %arg9[%c0_20, %c0_21, %c0_22, %c0_23] : memref<1x4x32x8xf32, #tpu.memory_space<vmem>>, vector<1x4x32x8xf32>
    %22 = vector.shape_cast %21 : vector<1x4x32x8xf32> to vector<4x32x8xf32>
    "tpu.trace_start"() <{level = 10 : i32, message = "hsd,hde->hse"}> : () -> ()
    %cst_24 = arith.constant dense<0.000000e+00> : vector<4x8x8xf32>
    %23 = tpu.matmul %6, %22, %cst_24 {dimension_numbers = #tpu.dot_dimension_numbers<[2], [1], [1], [2], [0, 0, 0, 1, 1, 2], [0], [0]>} : vector<4x8x32xf32>, vector<4x32x8xf32>, vector<4x8x8xf32> -> vector<4x8x8xf32>
    "tpu.trace_stop"() : () -> ()
    %c0_25 = arith.constant 0 : index
    %c0_26 = arith.constant 0 : index
    %c0_27 = arith.constant 0 : index
    %c0_28 = arith.constant 0 : index
    %24 = vector.load %arg10[%c0_25, %c0_26, %c0_27, %c0_28] : memref<1x4x1x8xf32, #tpu.memory_space<vmem>>, vector<1x4x1x8xf32>
    %25 = vector.shape_cast %24 : vector<1x4x1x8xf32> to vector<4x1x8xf32>
    %26 = vector.broadcast %25 : vector<4x1x8xf32> to vector<4x8x8xf32>
    %27 = arith.addf %23, %26 : vector<4x8x8xf32>
    "tpu.trace_start"() <{level = 10 : i32, message = "hqe,hke->hqk"}> : () -> ()
    %cst_29 = arith.constant dense<0.000000e+00> : vector<4x8x8xf32>
    %28 = tpu.matmul %13, %20, %cst_29 {dimension_numbers = #tpu.dot_dimension_numbers<[2], [2], [1], [1], [0, 0, 0, 1, 1, 1], [0], [0]>} : vector<4x8x8xf32>, vector<4x8x8xf32>, vector<4x8x8xf32> -> vector<4x8x8xf32>
    "tpu.trace_stop"() : () -> ()
    %cst_30 = arith.constant 0.353553385 : f32
    %29 = vector.broadcast %cst_30 : f32 to vector<4x8x8xf32>
    %30 = arith.mulf %28, %29 : vector<4x8x8xf32>
    %cst_31 = arith.constant dense<0xFF800000> : vector<4x8xf32>
    %31 = vector.multi_reduction <maximumf>, %30, %cst_31 [2] : vector<4x8x8xf32> to vector<4x8xf32>
    %32 = vector.shape_cast %31 : vector<4x8xf32> to vector<4x8x1xf32>
    %33 = vector.broadcast %32 : vector<4x8x1xf32> to vector<4x8x8xf32>
    %34 = arith.subf %30, %33 : vector<4x8x8xf32>
    %35 = math.exp %34 : vector<4x8x8xf32>
    %cst_32 = arith.constant dense<0.000000e+00> : vector<4x8xf32>
    %36 = vector.multi_reduction <add>, %35, %cst_32 [2] : vector<4x8x8xf32> to vector<4x8xf32>
    %37 = vector.shape_cast %36 : vector<4x8xf32> to vector<4x8x1xf32>
    %38 = tpu.reciprocal %37 {approx = true} : vector<4x8x1xf32> -> vector<4x8x1xf32>
    %39 = vector.broadcast %38 : vector<4x8x1xf32> to vector<4x8x8xf32>
    %40 = arith.mulf %35, %39 : vector<4x8x8xf32>
    "tpu.trace_start"() <{level = 10 : i32, message = "hqk,hke->hqe"}> : () -> ()
    %cst_33 = arith.constant dense<0.000000e+00> : vector<4x8x8xf32>
    %41 = tpu.matmul %40, %27, %cst_33 {dimension_numbers = #tpu.dot_dimension_numbers<[2], [1], [1], [2], [0, 0, 0, 1, 1, 2], [0], [0]>} : vector<4x8x8xf32>, vector<4x8x8xf32>, vector<4x8x8xf32> -> vector<4x8x8xf32>
    "tpu.trace_stop"() : () -> ()
    %c0_34 = arith.constant 0 : index
    %c0_35 = arith.constant 0 : index
    %c0_36 = arith.constant 0 : index
    %c0_37 = arith.constant 0 : index
    %42 = vector.load %arg11[%c0_34, %c0_35, %c0_36, %c0_37] : memref<1x4x8x32xf32, #tpu.memory_space<vmem>>, vector<1x4x8x32xf32>
    %43 = vector.shape_cast %42 : vector<1x4x8x32xf32> to vector<4x8x32xf32>
    "tpu.trace_start"() <{level = 10 : i32, message = "hqe,hed->hqd"}> : () -> ()
    %cst_38 = arith.constant dense<0.000000e+00> : vector<4x8x32xf32>
    %44 = tpu.matmul %41, %43, %cst_38 {dimension_numbers = #tpu.dot_dimension_numbers<[2], [1], [1], [2], [0, 0, 0, 1, 1, 2], [0], [0]>} : vector<4x8x8xf32>, vector<4x8x32xf32>, vector<4x8x32xf32> -> vector<4x8x32xf32>
    "tpu.trace_stop"() : () -> ()
    %cst_39 = arith.constant dense<0.000000e+00> : vector<8x32xf32>
    %45 = vector.multi_reduction <add>, %44, %cst_39 [0] : vector<4x8x32xf32> to vector<8x32xf32>
    %c0_40 = arith.constant 0 : index
    %c0_41 = arith.constant 0 : index
    %c0_42 = arith.constant 0 : index
    %46 = vector.load %arg12[%c0_40, %c0_41, %c0_42] : memref<1x1x32xf32, #tpu.memory_space<vmem>>, vector<1x1x32xf32>
    %47 = vector.shape_cast %46 : vector<1x1x32xf32> to vector<1x32xf32>
    %48 = vector.broadcast %47 : vector<1x32xf32> to vector<8x32xf32>
    %49 = arith.addf %45, %48 : vector<8x32xf32>
    %50 = arith.addf %4, %49 : vector<8x32xf32>
    %c0_43 = arith.constant 0 : index
    %c0_44 = arith.constant 0 : index
    %c0_45 = arith.constant 0 : index
    %51 = vector.load %arg13[%c0_43, %c0_44, %c0_45] : memref<1x1x32xf32, #tpu.memory_space<vmem>>, vector<1x1x32xf32>
    %52 = vector.shape_cast %51 : vector<1x1x32xf32> to vector<1x32xf32>
    %c0_46 = arith.constant 0 : index
    %c0_47 = arith.constant 0 : index
    %c0_48 = arith.constant 0 : index
    %53 = vector.load %arg14[%c0_46, %c0_47, %c0_48] : memref<1x1x32xf32, #tpu.memory_space<vmem>>, vector<1x1x32xf32>
    %54 = vector.shape_cast %53 : vector<1x1x32xf32> to vector<1x32xf32>
    %cst_49 = arith.constant dense<0.000000e+00> : vector<8xf32>
    %55 = vector.multi_reduction <add>, %50, %cst_49 [1] : vector<8x32xf32> to vector<8xf32>
    %56 = vector.shape_cast %55 : vector<8xf32> to vector<8x1xf32>
    %cst_50 = arith.constant 3.200000e+01 : f32
    %57 = vector.broadcast %cst_50 : f32 to vector<8x1xf32>
    %58 = arith.divf %56, %57 : vector<8x1xf32>
    %59 = vector.broadcast %58 : vector<8x1xf32> to vector<8x32xf32>
    %60 = arith.subf %50, %59 : vector<8x32xf32>
    %61 = arith.mulf %60, %60 : vector<8x32xf32>
    %cst_51 = arith.constant dense<0.000000e+00> : vector<8xf32>
    %62 = vector.multi_reduction <add>, %61, %cst_51 [1] : vector<8x32xf32> to vector<8xf32>
    %63 = vector.shape_cast %62 : vector<8xf32> to vector<8x1xf32>
    %cst_52 = arith.constant 3.100000e+01 : f32
    %64 = vector.broadcast %cst_52 : f32 to vector<8x1xf32>
    %65 = arith.divf %63, %64 : vector<8x1xf32>
    %66 = math.sqrt %65 : vector<8x1xf32>
    %67 = vector.broadcast %58 : vector<8x1xf32> to vector<8x32xf32>
    %68 = arith.subf %50, %67 : vector<8x32xf32>
    %69 = vector.broadcast %52 : vector<1x32xf32> to vector<8x32xf32>
    %70 = arith.mulf %69, %68 : vector<8x32xf32>
    %cst_53 = arith.constant 9.99999997E-7 : f32
    %71 = vector.broadcast %cst_53 : f32 to vector<8x1xf32>
    %72 = arith.addf %66, %71 : vector<8x1xf32>
    %73 = tpu.reciprocal %72 {approx = true} : vector<8x1xf32> -> vector<8x1xf32>
    %74 = vector.broadcast %73 : vector<8x1xf32> to vector<8x32xf32>
    %75 = arith.mulf %70, %74 : vector<8x32xf32>
    %76 = vector.broadcast %54 : vector<1x32xf32> to vector<8x32xf32>
    %77 = arith.addf %75, %76 : vector<8x32xf32>
    %c0_54 = arith.constant 0 : index
    %c0_55 = arith.constant 0 : index
    %c0_56 = arith.constant 0 : index
    %78 = vector.load %arg15[%c0_54, %c0_55, %c0_56] : memref<1x32x64xf32, #tpu.memory_space<vmem>>, vector<1x32x64xf32>
    %79 = vector.shape_cast %78 : vector<1x32x64xf32> to vector<32x64xf32>
    %cst_57 = arith.constant dense<0.000000e+00> : vector<8x64xf32>
    %80 = tpu.matmul %77, %79, %cst_57 {dimension_numbers = #tpu.dot_dimension_numbers<[1], [0], [0], [1], [0, 0, 1, 1], [], []>} : vector<8x32xf32>, vector<32x64xf32>, vector<8x64xf32> -> vector<8x64xf32>
    %c0_58 = arith.constant 0 : index
    %c0_59 = arith.constant 0 : index
    %c0_60 = arith.constant 0 : index
    %81 = vector.load %arg16[%c0_58, %c0_59, %c0_60] : memref<1x1x64xf32, #tpu.memory_space<vmem>>, vector<1x1x64xf32>
    %82 = vector.shape_cast %81 : vector<1x1x64xf32> to vector<1x64xf32>
    %83 = vector.broadcast %82 : vector<1x64xf32> to vector<8x64xf32>
    %84 = arith.addf %80, %83 : vector<8x64xf32>
    %cst_61 = arith.constant 0.000000e+00 : f32
    %85 = vector.broadcast %cst_61 : f32 to vector<8x64xf32>
    %86 = arith.maximumf %84, %85 : vector<8x64xf32>
    %c0_62 = arith.constant 0 : index
    %c0_63 = arith.constant 0 : index
    %c0_64 = arith.constant 0 : index
    %87 = vector.load %arg17[%c0_62, %c0_63, %c0_64] : memref<1x64x32xf32, #tpu.memory_space<vmem>>, vector<1x64x32xf32>
    %88 = vector.shape_cast %87 : vector<1x64x32xf32> to vector<64x32xf32>
    %cst_65 = arith.constant dense<0.000000e+00> : vector<8x32xf32>
    %89 = tpu.matmul %86, %88, %cst_65 {dimension_numbers = #tpu.dot_dimension_numbers<[1], [0], [0], [1], [0, 0, 1, 1], [], []>} : vector<8x64xf32>, vector<64x32xf32>, vector<8x32xf32> -> vector<8x32xf32>
    %c0_66 = arith.constant 0 : index
    %c0_67 = arith.constant 0 : index
    %c0_68 = arith.constant 0 : index
    %90 = vector.load %arg18[%c0_66, %c0_67, %c0_68] : memref<1x1x32xf32, #tpu.memory_space<vmem>>, vector<1x1x32xf32>
    %91 = vector.shape_cast %90 : vector<1x1x32xf32> to vector<1x32xf32>
    %92 = vector.broadcast %91 : vector<1x32xf32> to vector<8x32xf32>
    %93 = arith.addf %89, %92 : vector<8x32xf32>
    %94 = arith.addf %77, %93 : vector<8x32xf32>
    %c0_69 = arith.constant 0 : index
    %c0_70 = arith.constant 0 : index
    %c0_71 = arith.constant 0 : index
    %95 = vector.load %arg19[%c0_69, %c0_70, %c0_71] : memref<1x1x32xf32, #tpu.memory_space<vmem>>, vector<1x1x32xf32>
    %96 = vector.shape_cast %95 : vector<1x1x32xf32> to vector<1x32xf32>
    %c0_72 = arith.constant 0 : index
    %c0_73 = arith.constant 0 : index
    %c0_74 = arith.constant 0 : index
    %97 = vector.load %arg20[%c0_72, %c0_73, %c0_74] : memref<1x1x32xf32, #tpu.memory_space<vmem>>, vector<1x1x32xf32>
    %98 = vector.shape_cast %97 : vector<1x1x32xf32> to vector<1x32xf32>
    %cst_75 = arith.constant dense<0.000000e+00> : vector<8xf32>
    %99 = vector.multi_reduction <add>, %94, %cst_75 [1] : vector<8x32xf32> to vector<8xf32>
    %100 = vector.shape_cast %99 : vector<8xf32> to vector<8x1xf32>
    %cst_76 = arith.constant 3.200000e+01 : f32
    %101 = vector.broadcast %cst_76 : f32 to vector<8x1xf32>
    %102 = arith.divf %100, %101 : vector<8x1xf32>
    %103 = vector.broadcast %102 : vector<8x1xf32> to vector<8x32xf32>
    %104 = arith.subf %94, %103 : vector<8x32xf32>
    %105 = arith.mulf %104, %104 : vector<8x32xf32>
    %cst_77 = arith.constant dense<0.000000e+00> : vector<8xf32>
    %106 = vector.multi_reduction <add>, %105, %cst_77 [1] : vector<8x32xf32> to vector<8xf32>
    %107 = vector.shape_cast %106 : vector<8xf32> to vector<8x1xf32>
    %cst_78 = arith.constant 3.100000e+01 : f32
    %108 = vector.broadcast %cst_78 : f32 to vector<8x1xf32>
    %109 = arith.divf %107, %108 : vector<8x1xf32>
    %110 = math.sqrt %109 : vector<8x1xf32>
    %111 = vector.broadcast %102 : vector<8x1xf32> to vector<8x32xf32>
    %112 = arith.subf %94, %111 : vector<8x32xf32>
    %113 = vector.broadcast %96 : vector<1x32xf32> to vector<8x32xf32>
    %114 = arith.mulf %113, %112 : vector<8x32xf32>
    %cst_79 = arith.constant 9.99999997E-7 : f32
    %115 = vector.broadcast %cst_79 : f32 to vector<8x1xf32>
    %116 = arith.addf %110, %115 : vector<8x1xf32>
    %117 = tpu.reciprocal %116 {approx = true} : vector<8x1xf32> -> vector<8x1xf32>
    %118 = vector.broadcast %117 : vector<8x1xf32> to vector<8x32xf32>
    %119 = arith.mulf %114, %118 : vector<8x32xf32>
    %120 = vector.broadcast %98 : vector<1x32xf32> to vector<8x32xf32>
    %121 = arith.addf %119, %120 : vector<8x32xf32>
    %c0_80 = arith.constant 0 : index
    %c0_81 = arith.constant 0 : index
    %c0_82 = arith.constant 0 : index
    %122 = vector.load %arg21[%c0_80, %c0_81, %c0_82] : memref<1x8x32xf32, #tpu.memory_space<vmem>>, vector<1x8x32xf32>
    %123 = vector.shape_cast %122 : vector<1x8x32xf32> to vector<8x32xf32>
    %124 = vector.shape_cast %121 : vector<8x32xf32> to vector<1x8x32xf32>
    tpu.vector_store %arg21[%c0_80, %c0_81, %c0_82], %124 {strides = array<i32>} : memref<1x8x32xf32, #tpu.memory_space<vmem>>, vector<1x8x32xf32>,
    return
  }
  func.func @transform_0(%arg0: i32, %arg1: i32, %arg2: memref<2x8xi32, #tpu.memory_space<smem>>) -> (i32, i32) {
    %c0_i32 = arith.constant 0 : i32
    %c0_i32_0 = arith.constant 0 : i32
    %c0_i32_1 = arith.constant 0 : i32
    return %c0_i32, %c0_i32_0 : i32, i32
  }
  func.func @transform_1(%arg0: i32, %arg1: i32, %arg2: memref<2x8xi32, #tpu.memory_space<smem>>) -> (i32, i32) {
    %c0_i32 = arith.constant 0 : i32
    %c0_i32_0 = arith.constant 0 : i32
    %c0_i32_1 = arith.constant 0 : i32
    return %c0_i32, %c0_i32_0 : i32, i32
  }
  func.func @transform_2(%arg0: i32, %arg1: i32, %arg2: memref<2x8xi32, #tpu.memory_space<smem>>) -> (i32, i32, i32, i32) {
    %c0_i32 = arith.constant 0 : i32
    %c0_i32_0 = arith.constant 0 : i32
    %c0_i32_1 = arith.constant 0 : i32
    %c0_i32_2 = arith.constant 0 : i32
    return %arg1, %c0_i32, %c0_i32_0, %c0_i32_1 : i32, i32, i32, i32
  }
  func.func @transform_3(%arg0: i32, %arg1: i32, %arg2: memref<2x8xi32, #tpu.memory_space<smem>>) -> (i32, i32, i32, i32) {
    %c0_i32 = arith.constant 0 : i32
    %c0_i32_0 = arith.constant 0 : i32
    %c0_i32_1 = arith.constant 0 : i32
    %c0_i32_2 = arith.constant 0 : i32
    return %arg1, %c0_i32, %c0_i32_0, %c0_i32_1 : i32, i32, i32, i32
  }
  func.func @transform_4(%arg0: i32, %arg1: i32, %arg2: memref<2x8xi32, #tpu.memory_space<smem>>) -> (i32, i32, i32, i32) {
    %c0_i32 = arith.constant 0 : i32
    %c0_i32_0 = arith.constant 0 : i32
    %c0_i32_1 = arith.constant 0 : i32
    %c0_i32_2 = arith.constant 0 : i32
    return %arg1, %c0_i32, %c0_i32_0, %c0_i32_1 : i32, i32, i32, i32
  }
  func.func @transform_5(%arg0: i32, %arg1: i32, %arg2: memref<2x8xi32, #tpu.memory_space<smem>>) -> (i32, i32, i32, i32) {
    %c0_i32 = arith.constant 0 : i32
    %c0_i32_0 = arith.constant 0 : i32
    %c0_i32_1 = arith.constant 0 : i32
    %c0_i32_2 = arith.constant 0 : i32
    return %arg1, %c0_i32, %c0_i32_0, %c0_i32_1 : i32, i32, i32, i32
  }
  func.func @transform_6(%arg0: i32, %arg1: i32, %arg2: memref<2x8xi32, #tpu.memory_space<smem>>) -> (i32, i32, i32, i32) {
    %c0_i32 = arith.constant 0 : i32
    %c0_i32_0 = arith.constant 0 : i32
    %c0_i32_1 = arith.constant 0 : i32
    %c0_i32_2 = arith.constant 0 : i32
    return %arg1, %c0_i32, %c0_i32_0, %c0_i32_1 : i32, i32, i32, i32
  }
  func.func @transform_7(%arg0: i32, %arg1: i32, %arg2: memref<2x8xi32, #tpu.memory_space<smem>>) -> (i32, i32, i32, i32) {
    %c0_i32 = arith.constant 0 : i32
    %c0_i32_0 = arith.constant 0 : i32
    %c0_i32_1 = arith.constant 0 : i32
    %c0_i32_2 = arith.constant 0 : i32
    return %arg1, %c0_i32, %c0_i32_0, %c0_i32_1 : i32, i32, i32, i32
  }
  func.func @transform_8(%arg0: i32, %arg1: i32, %arg2: memref<2x8xi32, #tpu.memory_space<smem>>) -> (i32, i32, i32, i32) {
    %c0_i32 = arith.constant 0 : i32
    %c0_i32_0 = arith.constant 0 : i32
    %c0_i32_1 = arith.constant 0 : i32
    %c0_i32_2 = arith.constant 0 : i32
    return %arg1, %c0_i32, %c0_i32_0, %c0_i32_1 : i32, i32, i32, i32
  }
  func.func @transform_9(%arg0: i32, %arg1: i32, %arg2: memref<2x8xi32, #tpu.memory_space<smem>>) -> (i32, i32, i32) {
    %c0_i32 = arith.constant 0 : i32
    %c0_i32_0 = arith.constant 0 : i32
    %c0_i32_1 = arith.constant 0 : i32
    return %arg1, %c0_i32, %c0_i32_0 : i32, i32, i32
  }
  func.func @transform_10(%arg0: i32, %arg1: i32, %arg2: memref<2x8xi32, #tpu.memory_space<smem>>) -> (i32, i32, i32) {
    %c0_i32 = arith.constant 0 : i32
    %c0_i32_0 = arith.constant 0 : i32
    %c0_i32_1 = arith.constant 0 : i32
    return %arg1, %c0_i32, %c0_i32_0 : i32, i32, i32
  }
  func.func @transform_11(%arg0: i32, %arg1: i32, %arg2: memref<2x8xi32, #tpu.memory_space<smem>>) -> (i32, i32, i32) {
    %c0_i32 = arith.constant 0 : i32
    %c0_i32_0 = arith.constant 0 : i32
    %c0_i32_1 = arith.constant 0 : i32
    return %arg1, %c0_i32, %c0_i32_0 : i32, i32, i32
  }
  func.func @transform_12(%arg0: i32, %arg1: i32, %arg2: memref<2x8xi32, #tpu.memory_space<smem>>) -> (i32, i32, i32) {
    %c0_i32 = arith.constant 0 : i32
    %c0_i32_0 = arith.constant 0 : i32
    %c0_i32_1 = arith.constant 0 : i32
    return %arg1, %c0_i32, %c0_i32_0 : i32, i32, i32
  }
  func.func @transform_13(%arg0: i32, %arg1: i32, %arg2: memref<2x8xi32, #tpu.memory_space<smem>>) -> (i32, i32, i32) {
    %c0_i32 = arith.constant 0 : i32
    %c0_i32_0 = arith.constant 0 : i32
    %c0_i32_1 = arith.constant 0 : i32
    return %arg1, %c0_i32, %c0_i32_0 : i32, i32, i32
  }
  func.func @transform_14(%arg0: i32, %arg1: i32, %arg2: memref<2x8xi32, #tpu.memory_space<smem>>) -> (i32, i32, i32) {
    %c0_i32 = arith.constant 0 : i32
    %c0_i32_0 = arith.constant 0 : i32
    %c0_i32_1 = arith.constant 0 : i32
    return %arg1, %c0_i32, %c0_i32_0 : i32, i32, i32
  }
  func.func @transform_15(%arg0: i32, %arg1: i32, %arg2: memref<2x8xi32, #tpu.memory_space<smem>>) -> (i32, i32, i32) {
    %c0_i32 = arith.constant 0 : i32
    %c0_i32_0 = arith.constant 0 : i32
    %c0_i32_1 = arith.constant 0 : i32
    return %arg1, %c0_i32, %c0_i32_0 : i32, i32, i32
  }
  func.func @transform_16(%arg0: i32, %arg1: i32, %arg2: memref<2x8xi32, #tpu.memory_space<smem>>) -> (i32, i32, i32) {
    %c0_i32 = arith.constant 0 : i32
    %c0_i32_0 = arith.constant 0 : i32
    %c0_i32_1 = arith.constant 0 : i32
    return %arg1, %c0_i32, %c0_i32_0 : i32, i32, i32
  }
  func.func @transform_17(%arg0: i32, %arg1: i32, %arg2: memref<2x8xi32, #tpu.memory_space<smem>>) -> (i32, i32, i32) {
    %c0_i32 = arith.constant 0 : i32
    %c0_i32_0 = arith.constant 0 : i32
    %c0_i32_1 = arith.constant 0 : i32
    return %arg1, %c0_i32, %c0_i32_0 : i32, i32, i32
  }
  func.func @transform_18(%arg0: i32, %arg1: i32, %arg2: memref<2x8xi32, #tpu.memory_space<smem>>) -> (i32, i32, i32) {
    %c0_i32 = arith.constant 0 : i32
    %c0_i32_0 = arith.constant 0 : i32
    %c0_i32_1 = arith.constant 0 : i32
    return %arg0, %c0_i32, %c0_i32_0 : i32, i32, i32
  }
}

</mosaic_0001>

<bundles_post_ra>
// kernel: tpu_custom_call.1
= control target key start
LH: loop header
LB: loop body
LE: loop exit
PB: predicated region body
PF: predicated region fallthrough
CT: control target
= control target key end

     0   :  { %s4791_s0 = inlined_call_operand.vmem [shape: s32[2,8], index: 0, kind: input, shape index: {}]   ;;  %s4792_s1 = inlined_call_operand.vmem [shape: f32[64,32], index: 1, kind: input, shape index: {}]   ;;  %s4793_s2 = inlined_call_operand.vmem [shape: f32[8,32], index: 2, kind: input, shape index: {}]   ;;  %s4794_s3 = inlined_call_operand.vmem [shape: f32[2,4,32,8], index: 3, kind: input, shape index: {}]   ;;  %s4795_s4 = inlined_call_operand.vmem [shape: f32[2,4,1,8], index: 4, kind: input, shape index: {}]   ;;  %s4796_s5 = inlined_call_operand.vmem [shape: f32[2,4,32,8], index: 5, kind: input, shape index: {}]   ;;  %s4797_s6 = inlined_call_operand.vmem [shape: f32[2,4,1,8], index: 6, kind: input, shape index: {}]   ;;  %s4798_s7 = inlined_call_operand.vmem [shape: f32[2,4,32,8], index: 7, kind: input, shape index: {}]   ;;  %s4799_s8 = inlined_call_operand.vmem [shape: f32[2,4,1,8], index: 8, kind: input, shape index: {}]   ;;  %s4800_s9 = inlined_call_operand.vmem [shape: f32[2,4,8,32], index: 9, kind: input, shape index: {}]   ;;  %s4801_s10 = inlined_call_operand.vmem [shape: f32[2,1,32], index: 10, kind: input, shape index: {}]   ;;  %s4802_s11 = inlined_call_operand.vmem [shape: f32[2,1,32], index: 11, kind: input, shape index: {}]   ;;  %s4803_s12 = inlined_call_operand.vmem [shape: f32[2,1,32], index: 12, kind: input, shape index: {}]   ;;  %s4804_s13 = inlined_call_operand.vmem [shape: f32[2,32,64], index: 13, kind: input, shape index: {}]   ;;  %s4805_s14 = inlined_call_operand.vmem [shape: f32[2,1,64], index: 14, kind: input, shape index: {}]   ;;  %s4806_s15 = inlined_call_operand.vmem [shape: f32[2,64,32], index: 15, kind: input, shape index: {}]   ;;  %s4807_s16 = inlined_call_operand.vmem [shape: f32[2,1,32], index: 16, kind: input, shape index: {}]   ;;  %s4808_s17 = inlined_call_operand.vmem [shape: f32[2,1,32], index: 17, kind: input, shape index: {}]   ;;  %s4809_s18 = inlined_call_operand.vmem [shape: f32[2,1,32], index: 18, kind: input, shape index: {}]   ;;  %s4810_s19 = inlined_call_operand.hbm [shape: f32[2,8,32], index: 19, kind: output, shape index: {}]  }
   0x1   :  { %4829 = sst [smem:[#allocation24_spill]] %s4791_s0 }
   0x2   :  { %4830 = sst [smem:[#allocation25_spill]] %s4792_s1  ;;  %s4842_s20 = sld [smem:[#allocation24_spill]] }
   0x3   :  { %4831 = sst [smem:[#allocation26_spill]] %s4793_s2 }
   0x4   :  { %4832 = sst [smem:[#allocation27_spill]] %s4794_s3 }
   0x5   :  { %4833 = sst [smem:[#allocation28_spill]] %s4795_s4 }
   0x6   :  { %4834 = sst [smem:[#allocation29_spill]] %s4796_s5 }
   0x7   :  { %4835 = sst [smem:[#allocation30_spill]] %s4797_s6 }
   0x8   :  { %4836 = sst [smem:[#allocation31_spill]] %s4798_s7 }
   0x9   :  { %4837 = sst [smem:[#allocation32_spill]] %s4799_s8 }
   0xa   :  { %4838 = sst [smem:[#allocation33_spill]] %s4800_s9 }
   0xb   :  { %4839 = sst [smem:[#allocation34_spill]] %s4801_s10 }
   0xc   :  { %4840 = sst [smem:[#allocation35_spill]] %s4804_s13  ;;  %s24_s13 = sshll.u32 %s4842_s20, 4  ;;  %s25_s13 = int_to_ptr.vmem [resolvable:$true] %s24_s13 }
   0xd   :  { %4841 = sst [smem:[#allocation36_spill]] %s4810_s19  ;;  %s4032_s21 = scalar_lea.vmem %s25_s13, 32 }
   0xe   :  { %p4033_p0 = scmp.ne.s32.totalorder %s25_s13, %s4032_s21  ;;  %p4037_p1 = scmp.lt.s32.totalorder %s25_s13, %s25_s13 }
   0xf   :  { %p4038_p2 = scmp.lt.s32.totalorder %s4032_s21, %s4032_s21 }
  0x11   :  { %p4039_p3 = por %p4038_p2, %p4037_p1 }
  0x13   :  { %p4040_p4 = pnand %p4039_p3, %p4033_p0 }
  0x15   :  { %4043 = shalt.err (!%p4040_p4)  }
  0x16   :  { %s4142_s1 = smov [#allocation3]  }
  0x17   :  { %27 = dma.vmem_to_smem %s25_s13, 32, %s4142_s1, [#allocation2] }
  0x18   :  { %4104 = dma.done.wait [#allocation2], 32 }
  0x19   :  { %4105 = vsyncadd [#allocation2], 4294967264 }
  0x1a   :  { %29 = sfence }
  0x1b   :  { %30 = vsyncpa [#allocation5], 0 }
  0x1c   :  { %32 = vsyncpa [#allocation5 + $0x1], 0  ;;  %s4250_s22 = smov 0   ;;  %s4252_s2 = smov 0  }
  0x1d   :  { %s4254_s23 = smov 0   ;;  %s4256_s24 = smov 0  }
  0x1e   :  { %s4258_s25 = smov 0   ;;  %s4260_s3 = smov 0  }
  0x1f   :  { %s4262_s26 = smov 0   ;;  %s4264_s13 = smov 0  }
  0x20 LB: > { %4843 = sst [smem:[#allocation8_spill]] %s4112_s22  ;;  %s3385_s27 = sadd.s32 4294967295, %s4140_s13   ;;  %s4140_s13 = sphi %s4264_s13, %s38_s13   ;;  %s4136_s26 = sphi %s4262_s26, %s4901_s26   ;;  %s4132_s3 = sphi %s4260_s3, %s4900_s3   ;;  %s4128_s25 = sphi %s4258_s25, %s4899_s25   ;;  %s4124_s24 = sphi %s4256_s24, %s4898_s24   ;;  %s4120_s23 = sphi %s4254_s23, %s4897_s23   ;;  %s4116_s2 = sphi %s4252_s2, %s4896_s2   ;;  %s4112_s22 = sphi %s4250_s22, %s4895_s22  }
  0x21   : > { %4844 = sst [smem:[#allocation9_spill]] %s4116_s2  ;;  %s3386_s28 = sadd.s32 4294967294, %s4140_s13  }
  0x22   : > { %4845 = sst [smem:[#allocation10_spill]] %s4120_s23  ;;  %s47_s29 = sadd.s32 1, %s4132_s3 }
  0x23   : > { %4846 = sst [smem:[#allocation11_spill]] %s4124_s24  ;;  %p48_p5 = scmp.ge.s32.totalorder %s47_s29, 2 }
  0x24   : > { %4847 = sst [smem:[#allocation12_spill]] %s4128_s25  ;;  %s50_s0 = sadd.s32 1, %s4136_s26 }
  0x25   : > { %4848 = sst [smem:[#allocation13_spill]] %s4132_s3  ;;  %p525_p6 = scmp.ne.s32.totalorder %s4120_s23, %s4116_s2 }
  0x26   : > { %4849 = sst [smem:[#allocation14_spill]] %s4136_s26  ;;  %p526_p7 = scmp.eq.s32.totalorder %s3385_s27, 3 }
  0x27   : > { %4850 = sst [smem:[#allocation15_spill]] %s4140_s13  ;;  %s4903_s29 = smov (%p48_p5, %s47_s29), 0 }
  0x28   : > { %4851 = sst [smem:[#allocation16_spill]] %s4903_s29  ;;  %s4905_s0 = smov (!%p48_p5, %s50_s0), %s4136_s26 }
  0x29   : > { %p4299_p8 = por %p526_p7, %p525_p6  ;;  %p531_p9 = scmp.ne.s32.totalorder %s4116_s2, %s4112_s22 }
  0x2a   : > { %p52_p10 = scmp.ge.s32.totalorder %s4905_s0, 2  ;;  %p532_p11 = scmp.eq.s32.totalorder %s3386_s28, 3 }
  0x2b   : > { %s4852_s30 = scalar_select %p4299_p8, 1, 0 }
  0x2c   : > { %p3389_p12 = scmp.ge.s32.totalorder %s4140_s13, 1  ;;  %p667_p13 = scmp.lt.s32.totalorder %s4140_s13, 5 }
  0x2d   : > { %4853 = sst [smem:[#allocation17_spill]] %s4852_s30  ;;  %s4907_s0 = smov (%p52_p10, %s4905_s0), 0 }
  0x2e   : > { %4854 = sst [smem:[#allocation18_spill]] %s4907_s0  ;;  %p4309_p0 = por %p532_p11, %p531_p9 }
  0x2f   : > { %p668_p1 = pnand %p3389_p12, %p667_p13  ;;  %s512_s21 = ssub.s32 %s4136_s26, %s4907_s0 }
  0x30   : > { %s4855_s20 = scalar_select %p4309_p0, 1, 0 }
  0x31   : > { %s515_s1 = sadd.s32 1, %s4120_s23  ;;  %p513_p2 = scmp.eq.s32.totalorder %s512_s21, 0 }
  0x32   : > { %4856 = sst [smem:[#allocation19_spill]] %s4855_s20  ;;  %671 = sbr.rel (%p668_p1) target bundleno = 2446 (0x98e), region = 92 }
  0x33   : > { %s4317_s27 = scalar_select %p513_p2, %s4120_s23, %s515_s1  }
  0x35   : > { %4857 = sst [smem:[#allocation20_spill]] %s4317_s27 }
  0x39   : > { %s4817_s28 = sand.u32 1, %s4116_s2   ;;  %p779_p3 = scmp.lt.s32.totalorder %s4124_s24, 1 }
  0x3a   : > { %s3390_s29 = sshll.u32 %s4817_s28, 3  ;;  %s4858_s27 = sld [smem:[#allocation27_spill]] }
  0x3b   : > { %s4324_s3 = scalar_select %p779_p3, %s4124_s24, 1 }
  0x3c   : > { %s4860_s4 = sld [smem:[#allocation28_spill]]  ;;  %s4862_s5 = sld [smem:[#allocation29_spill]] }
  0x3d   : > { %s3501_s21 = sshll.u32 %s4324_s3, 7  ;;  %s3393_s1 = sshll.u32 %s4324_s3, 2 }
  0x3e   : > { %s4864_s6 = sld [smem:[#allocation30_spill]]  ;;  %s4865_s7 = sld [smem:[#allocation31_spill]] }
  0x3f   : > { %s4866_s8 = sld [smem:[#allocation32_spill]]  ;;  %s4868_s9 = sld [smem:[#allocation33_spill]] }
  0x40   : > { %s4331_s23 = scalar_lea.vmem %s4858_s27, %s3501_s21  ;;  %s4403_s19 = scalar_lea.vmem [#allocation4], %s3390_s29 }
  0x41   : > { %4859 = sst [smem:[#allocation21_spill]] %s4331_s23  ;;  %s3506_s23 = sshll.u32 %s4324_s3, 6 }
  0x42   : > { %s4336_s22 = scalar_lea.vmem %s4860_s4, %s3393_s1  ;;  %s4341_s30 = scalar_lea.vmem %s4862_s5, %s3501_s21 }
  0x43   : > { %4861 = sst [smem:[#allocation22_spill]] %s4336_s22  ;;  %s3504_s22 = sshll.u32 %s4324_s3, 5 }
  0x44   : > { %4863 = sst [smem:[#allocation23_spill]] %s4341_s30  ;;  %s4346_s24 = scalar_lea.vmem %s4864_s6, %s3393_s1 }
  0x45   : > { %s4351_s27 = scalar_lea.vmem %s4865_s7, %s3501_s21  ;;  %s4356_s4 = scalar_lea.vmem %s4866_s8, %s3393_s1 }
  0x46   : > { %s4366_s2 = scalar_lea.vmem %s4868_s9, %s3504_s22  ;;  %s4869_s7 = sld [smem:[#allocation35_spill]] }
  0x47   : > { %s4389_s10 = scalar_lea.vmem %s4806_s15, %s3506_s23  ;;  %s4870_s13 = sld [smem:[#allocation11_spill]] }
  0x4c   : > { %s4379_s8 = scalar_lea.vmem %s4869_s7, %s3504_s22 }
  0x4d   : > { %p3406_p4 = scmp.ne.s32.totalorder %s4870_s13, 0 }
  0x4e   : > { %s4871_s9 = sld [smem:[#allocation12_spill]] (!%p3406_p4)  ;;  %vm931_vm0 = vcmask (!%p3406_p4), 1040384   ;;  %vm933_vm1 = vcmask (!%p3406_p4), 1041408   ;;  %vm935_vm2 = vcmask (!%p3406_p4), 1042432   ;;  %vm937_vm3 = vcmask (!%p3406_p4), 1043456  }
  0x4f   : > { %845 = sbr.rel (%p3406_p4) target bundleno = 128 (0x80), region = 96  ;;  %vm939_vm4 = vcmask (!%p3406_p4), 1044480   ;;  %vm941_vm5 = vcmask (!%p3406_p4), 1045504   ;;  %vm943_vm6 = vcmask (!%p3406_p4), 1046528   ;;  %vm948_vm7 = vcmask (!%p3406_p4), 261120  }
  0x54   : > { %s4407_s23 = sshll.u32 (!%p3406_p4), %s4871_s9, 7 }
  0x55   : > { %s847_s20 = sld [smem:[#allocation3 + %s4407_s23]] (!%p3406_p4)  ;;  %s854_s30 = sadd.s32 (!%p3406_p4), 1, %s4407_s23 }
  0x56   : > { %s855_s6 = sld [smem:[#allocation3 + %s854_s30]]  ;;  %s862_s25 = sadd.s32 2, %s4407_s23 }
  0x57   : > { %s863_s0 = sld [smem:[#allocation3 + %s862_s25]]  ;;  %s870_s29 = sadd.s32 3, %s4407_s23 }
  0x58   : > { %s871_s7 = sld [smem:[#allocation3 + %s870_s29]]  ;;  %s878_s22 = sadd.s32 4, %s4407_s23 }
  0x59   : > { %s4414_s13 = sld [smem:[#allocation3 + %s878_s22]]  ;;  %s886_s28 = sadd.s32 5, %s4407_s23 }
  0x5a   : > { %s4417_s9 = sld [smem:[#allocation3 + %s886_s28]] }
  0x5b   : > { %p848_p5 = scmp.gt.s32.totalorder %s847_s20, 0  ;;  %p3408_p6 = scmp.lt.s32.totalorder %s847_s20, 63 }
  0x5c   : > { %p856_p7 = scmp.gt.s32.totalorder %s855_s6, 0  ;;  %p3413_p9 = scmp.lt.s32.totalorder %s855_s6, 63 }
  0x5d   : > { %s4909_s20 = smov (!%p848_p5, %s847_s20), 0  ;;  %s4872_s29 = sld [smem:[#allocation25_spill]] }
  0x5e   : > { %s4911_s6 = smov (!%p856_p7, %s855_s6), 0  ;;  %s4913_s20 = smov (!%p3408_p6, %s4909_s20), 63 }
  0x5f   : > { %s4915_s6 = smov (!%p3413_p9, %s4911_s6), 63  ;;  %p864_p10 = scmp.gt.s32.totalorder %s863_s0, 0 }
  0x60   : > { %p3418_p11 = scmp.lt.s32.totalorder %s863_s0, 63  ;;  %p872_p12 = scmp.gt.s32.totalorder %s871_s7, 0 }
  0x61   : > { %s4917_s0 = smov (!%p864_p10, %s863_s0), 0  ;;  %p3423_p13 = scmp.lt.s32.totalorder %s871_s7, 63 }
  0x62   : > { %s4919_s0 = smov (!%p3418_p11, %s4917_s0), 63  ;;  %s4921_s7 = smov (!%p872_p12, %s871_s7), 0 }
  0x63   : > { %s852_s22 = scalar_lea.vmem %s4872_s29, %s4913_s20  ;;  %s860_s5 = scalar_lea.vmem %s4872_s29, %s4915_s6 }
  0x64   : > { %s868_s30 = scalar_lea.vmem %s4872_s29, %s4919_s0  ;;  %p880_p1 = scmp.gt.s32.totalorder %s4414_s13, 0  ;;  %v861_v0 = vld [vmem:[%s860_s5] sm:$0x1] }
  0x65   : > { %s4923_s7 = smov (!%p3423_p13, %s4921_s7), 63  ;;  %p3428_p2 = scmp.lt.s32.totalorder %s4414_s13, 63  ;;  %v869_v1 = vld [vmem:[%s868_s30] sm:$0x1]  ;;  %v911_v2 = vrot.slane %v861_v0, 7 }
  0x66   : > { %s881_s20 = scalar_select %p880_p1, %s4414_s13, 0  ;;  %v853_v3 = vld [vmem:[%s852_s22] sm:$0x1]  ;;  %v914_v5 = vrot.slane %v869_v1, 6 }
  0x67   : > { %s876_s6 = scalar_lea.vmem %s4872_s29, %s4923_s7  ;;  %p888_p3 = scmp.gt.s32.totalorder %s4417_s9, 0  ;;  %v932_v6 = vsel %vm931_vm0, %v853_v3, %v911_v2 }
  0x68   : > { %p3433_p4 = scmp.lt.s32.totalorder %s4417_s9, 63  ;;  %s4925_s20 = smov (!%p3428_p2, %s881_s20), 63  ;;  %v877_v4 = vld [vmem:[%s876_s6] sm:$0x1]  ;;  %v934_v9 = vsel %vm933_vm1, %v932_v6, %v914_v5 }
  0x69   : > { %s4927_s9 = smov (!%p888_p3, %s4417_s9), 0  ;;  %s884_s5 = scalar_lea.vmem %s4872_s29, %s4925_s20  ;;  %v917_v8 = vrot.slane %v877_v4, 5 }
  0x6a   : > { %s4873_s0 = sadd.s32 6, %s4407_s23  ;;  %s4929_s9 = smov (!%p3433_p4, %s4927_s9), 63  ;;  %v885_v7 = vld [vmem:[%s884_s5] sm:$0x1] }
  0x6b   : > { %s895_s28 = sld [smem:[#allocation3 + %s4873_s0]]  ;;  %s902_s7 = sadd.s32 7, %s4407_s23  ;;  %v920_v11 = vrot.slane %v885_v7, 4  ;;  %v936_v12 = vsel %vm935_vm2, %v934_v9, %v917_v8 }
  0x6c   : > { %s892_s22 = scalar_lea.vmem %s4872_s29, %s4929_s9  ;;  %s903_s26 = sld [smem:[#allocation3 + %s902_s7]] }
  0x6d   : > { %v893_v10 = vld [vmem:[%s892_s22] sm:$0x1]  ;;  %v938_v14 = vsel %vm937_vm3, %v936_v12, %v920_v11  ;;  %s4874_s0 = sld [smem:[#allocation26_spill]] }
  0x6e   : > { %v923_v13 = vrot.slane %v893_v10, 3 }
  0x70   : > { %v940_v16 = vsel %vm939_vm4, %v938_v14, %v923_v13 }
  0x71   : > { %p896_p5 = scmp.gt.s32.totalorder %s895_s28, 0  ;;  %p3438_p6 = scmp.lt.s32.totalorder %s895_s28, 63 }
  0x72   : > { %p904_p7 = scmp.gt.s32.totalorder %s903_s26, 0  ;;  %p3443_p9 = scmp.lt.s32.totalorder %s903_s26, 63 }
  0x73   : > { %s4931_s28 = smov (!%p896_p5, %s895_s28), 0  ;;  %v946_v22 = vld [vmem:[%s4874_s0] sm:$0xff] }
  0x74   : > { %s4933_s28 = smov (!%p3438_p6, %s4931_s28), 63  ;;  %s4935_s26 = smov (!%p904_p7, %s903_s26), 0 }
  0x75   : > { %s900_s20 = scalar_lea.vmem %s4872_s29, %s4933_s28  ;;  %s4937_s26 = smov (!%p3443_p9, %s4935_s26), 63 }
  0x76   : > { %v901_v15 = vld [vmem:[%s900_s20] sm:$0x1]  ;;  %s908_s21 = scalar_lea.vmem %s4872_s29, %s4937_s26 }
  0x77   : > { %v926_v17 = vrot.slane %v901_v15, 2  ;;  %v909_v18 = vld [vmem:[%s908_s21] sm:$0x1] }
  0x78   : > { %v929_v20 = vrot.slane %v909_v18, 1 }
  0x79   : > { %v942_v19 = vsel %vm941_vm5, %v940_v16, %v926_v17 }
  0x7a   : > { %v944_v21 = vsel %vm943_vm6, %v942_v19, %v929_v20 }
  0x7b   : > { %v945_v23 = vmul.f32 5.656854, %v944_v21 }
  0x7d   : > { %v947_v24 = vadd.f32 %v946_v22, %v945_v23 }
  0x7f   : > { %949 = vst.msk [vmem:[%s4403_s19] sm:$0xff] %vm948_vm7, %v947_v24 }
  0x80 PF: > { %s4875_s28 = sld [smem:[#allocation21_spill]]  ;;  %v4143_v28 = vmov 0.0|0.0   ;;  %vm4144_vm8 = vmmov 0   ;;  %v4145_v36 = vmov 0.0   ;;  %vm995_vm9 = vcmask 261120   ;;  %s4876_s7 = sld [smem:[#allocation23_spill]] }
  0x81   : > { %3843 = vmatprep.subr.bf16.mxu0 %v4143_v28  ;;  %3849 = vmatprep.subr.bf16.mxu1 %v4143_v28  ;;  %v1603_v12 = vld [vmem:[%s4351_s27] sm:$0xff]  ;;  %v1604_v13 = vld [vmem:[%s4351_s27 + $0x8] sm:$0xff]  ;;  %v1605_v15 = vld [vmem:[%s4351_s27 + $0x10] sm:$0xff]  ;;  %s4877_s13 = sld [smem:[#allocation22_spill]]  ;;  %vm1927_vm10 = vcmask 64512   ;;  %s4880_s22 = scalar_lea.vmem %s4802_s11, %s4324_s3  ;;  %vm3022_vm13 = vcmask 523264  }
  0x82   : > { %3629 = vmatprep.mubr.msk.f32.mxu0 %vm4144_vm8, %v4145_v36  ;;  %3640 = vmatprep.mubr.msk.f32.mxu1 %vm4144_vm8, %v4145_v36  ;;  %v3892_v14 = vpack.c.bf16 %v1604_v13, %v1603_v12  ;;  %v1606_v16 = vld [vmem:[%s4351_s27 + $0x18] sm:$0xff]  ;;  %v1607_v18 = vld [vmem:[%s4351_s27 + $0x20] sm:$0xff]  ;;  %v1608_v19 = vld [vmem:[%s4351_s27 + $0x28] sm:$0xff]  ;;  %s4881_s9 = scalar_lea.vmem %s4803_s12, %s4324_s3  ;;  %s4882_s6 = scalar_lea.vmem %s4805_s14, %s4324_s3 }
  0x83   : > { %v3895_v17 = vpack.c.bf16 %v1606_v16, %v1605_v15  ;;  %v1611_v20 = vld [vmem:[%s4351_s27 + $0x40] sm:$0xff]  ;;  %v3898_v21 = vpack.c.bf16 %v1608_v19, %v1607_v18  ;;  %v1612_v22 = vld [vmem:[%s4351_s27 + $0x48] sm:$0xff]  ;;  %v1609_v24 = vld [vmem:[%s4351_s27 + $0x30] sm:$0xff]  ;;  %s4883_s5 = scalar_lea.vmem %s4807_s16, %s4324_s3  ;;  %s4885_s0 = sld [smem:[#allocation9_spill]] }
  0x84   : > { %v3904_v23 = vpack.c.bf16 %v1612_v22, %v1611_v20  ;;  %s3148_s30 = sshll.u32 %s4403_s19, 4  ;;  %s4889_s23 = sld [smem:[#allocation36_spill]]  ;;  %s4736_s30 = int_to_ptr.vmem [resolvable:$true] %s3148_s30 }
  0x85   : > { %s4146_s21 = smov [#allocation4]  }
  0x86   : > { %v951_v25 = vld [vmem:[%s4875_s28] sm:$0xff]  ;;  %v952_v26 = vld [vmem:[%s4875_s28 + $0x8] sm:$0xff]  ;;  %v953_v31 = vld [vmem:[%s4875_s28 + $0x10] sm:$0xff]  ;;  %s4048_s1 = sshll.u32 %s4146_s21, 4  ;;  %s4049_s1 = int_to_ptr.vmem [resolvable:$false] %s4048_s1 }
  0x87   : > { %v955_v27 = vld [vmem:[%s4875_s28 + $0x20] sm:$0xff]  ;;  %v3844_v29 = vpack.c.bf16 %v952_v26, %v951_v25  ;;  %v956_v30 = vld [vmem:[%s4875_s28 + $0x28] sm:$0xff]  ;;  %v954_v32 = vld [vmem:[%s4875_s28 + $0x18] sm:$0xff]  ;;  %p4051_p13 = scmp.lt.s32.totalorder %s4736_s30, %s4049_s1 }
  0x88   : > { %v3850_v33 = vpack.c.bf16 %v956_v30, %v955_v27  ;;  %v957_v34 = vld [vmem:[%s4875_s28 + $0x30] sm:$0xff]  ;;  %v958_v35 = vld [vmem:[%s4875_s28 + $0x38] sm:$0xff]  ;;  %v3847_v37 = vpack.c.bf16 %v954_v32, %v953_v31  ;;  %v959_v39 = vld [vmem:[%s4875_s28 + $0x40] sm:$0xff] }
  0x89   : > { %3845 = vmatpush3.bf16.msra.mxu0 %v3844_v29  ;;  %v3853_v38 = vpack.c.bf16 %v958_v35, %v957_v34  ;;  %v960_v40 = vld [vmem:[%s4875_s28 + $0x48] sm:$0xff]  ;;  %v963_v41 = vld [vmem:[%s4875_s28 + $0x60] sm:$0xff]  ;;  %v961_v46 = vld [vmem:[%s4875_s28 + $0x50] sm:$0xff]  ;;  %s4891_s25 = sand.u32 1, %s4885_s0  }
  0x8a   : > { %3851 = vmatpush3.bf16.msra.mxu1 %v3850_v33  ;;  %3846 = vmatprep.subr.bf16.mxu0 %v4143_v28  ;;  %v964_v42 = vld [vmem:[%s4875_s28 + $0x68] sm:$0xff]  ;;  %v3856_v44 = vpack.c.bf16 %v960_v40, %v959_v39  ;;  %v962_v47 = vld [vmem:[%s4875_s28 + $0x58] sm:$0xff]  ;;  %v965_v48 = vld [vmem:[%s4875_s28 + $0x70] sm:$0xff] }
  0x8b   : > { %3852 = vmatprep.subr.bf16.mxu1 %v4143_v28  ;;  %v4478_v43 = vld [vmem:[%s4403_s19] sm:$0xff]  ;;  %v3862_v45 = vpack.c.bf16 %v964_v42, %v963_v41  ;;  %v966_v49 = vld [vmem:[%s4875_s28 + $0x78] sm:$0xff]  ;;  %v3859_v50 = vpack.c.bf16 %v962_v47, %v961_v46  ;;  %v1281_v58 = vld [vmem:[%s4876_s7 + $0x10] sm:$0xff] }
  0x8c   : > { %v3865_v51 = vpack.c.bf16 %v966_v49, %v965_v48  ;;  %v1279_v52 = vld [vmem:[%s4876_s7] sm:$0xff]  ;;  %v1280_v53 = vld [vmem:[%s4876_s7 + $0x8] sm:$0xff]  ;;  %v1282_v59 = vld [vmem:[%s4876_s7 + $0x18] sm:$0xff] }
  0x8d   : > { %3848 = vmatpush3.bf16.msra.mxu0 %v3847_v37  ;;  %v1283_v54 = vld [vmem:[%s4876_s7 + $0x20] sm:$0xff]  ;;  %v1284_v55 = vld [vmem:[%s4876_s7 + $0x28] sm:$0xff]  ;;  %v3868_v56 = vpack.c.bf16 %v1280_v53, %v1279_v52  ;;  %v1285_v60 = vld [vmem:[%s4876_s7 + $0x30] sm:$0xff]  ;;  %v3871_v62 = vpack.c.bf16 %v1282_v59, %v1281_v58 }
  0x8e   : > { %3854 = vmatpush3.bf16.msra.mxu1 %v3853_v38  ;;  %3855 = vmatprep.subr.bf16.mxu0 %v4143_v28  ;;  %v3874_v57 = vpack.c.bf16 %v1284_v55, %v1283_v54  ;;  %v1286_v61 = vld [vmem:[%s4876_s7 + $0x38] sm:$0xff]  ;;  %v1287_v0 = vld [vmem:[%s4876_s7 + $0x40] sm:$0xff]  ;;  %v1288_v1 = vld [vmem:[%s4876_s7 + $0x48] sm:$0xff] }
  0x8f   : > { %3861 = vmatprep.subr.bf16.mxu1 %v4143_v28  ;;  %v3877_v63 = vpack.c.bf16 %v1286_v61, %v1285_v60  ;;  %v1291_v2 = vld [vmem:[%s4876_s7 + $0x60] sm:$0xff]  ;;  %v1292_v3 = vld [vmem:[%s4876_s7 + $0x68] sm:$0xff]  ;;  %v3880_v4 = vpack.c.bf16 %v1288_v1, %v1287_v0  ;;  %v1289_v6 = vld [vmem:[%s4876_s7 + $0x50] sm:$0xff] }
  0x90   : > { %3630 = vmatmul.mubr.msk.f32.vlgmr.msra.gmra.mrb[0].mxu0 %vm995_vm9, %v4478_v43  ;;  %v3886_v5 = vpack.c.bf16 %v1292_v3, %v1291_v2  ;;  %v1290_v7 = vld [vmem:[%s4876_s7 + $0x58] sm:$0xff]  ;;  %v1293_v8 = vld [vmem:[%s4876_s7 + $0x70] sm:$0xff]  ;;  %v1615_v31 = vld [vmem:[%s4351_s27 + $0x60] sm:$0xff] }
  0x91   : > { %3641 = vmatmul.mubr.msk.f32.vlgmr.msra.gmra.mrb[0].mxu1 %vm995_vm9, %v4478_v43  ;;  %3857 = vmatpush3.bf16.msra.mxu0 %v3856_v44  ;;  %v1294_v9 = vld [vmem:[%s4876_s7 + $0x78] sm:$0xff]  ;;  %v3883_v10 = vpack.c.bf16 %v1290_v7, %v1289_v6  ;;  %v1613_v26 = vld [vmem:[%s4351_s27 + $0x50] sm:$0xff]  ;;  %v1616_v32 = vld [vmem:[%s4351_s27 + $0x68] sm:$0xff] }
  0x92   : > { %3863 = vmatpush3.bf16.msra.mxu1 %v3862_v45  ;;  %3858 = vmatprep.subr.bf16.mxu0 %v4143_v28  ;;  %v3889_v11 = vpack.c.bf16 %v1294_v9, %v1293_v8  ;;  %v1610_v25 = vld [vmem:[%s4351_s27 + $0x38] sm:$0xff]  ;;  %v3910_v33 = vpack.c.bf16 %v1616_v32, %v1615_v31  ;;  %v1617_v34 = vld [vmem:[%s4351_s27 + $0x70] sm:$0xff]  ;;  %v3456_v47 = vld [vmem:[%s4346_s24] ss:$0 sm:$0xff] }
  0x93   : > { %3864 = vmatprep.subr.bf16.mxu1 %v4143_v28  ;;  %3651 = vmatprep.mubr.msk.f32.mxu0 %vm4144_vm8, %v4145_v36  ;;  %v3901_v27 = vpack.c.bf16 %v1610_v25, %v1609_v24  ;;  %v1614_v29 = vld [vmem:[%s4351_s27 + $0x58] sm:$0xff]  ;;  %v3457_v49 = vld [vmem:[%s4346_s24 + $0x1] ss:$0 sm:$0xff]  ;;  %v3458_v58 = vld [vmem:[%s4346_s24 + $0x2] ss:$0 sm:$0xff] }
  0x94   : > { %3662 = vmatprep.mubr.msk.f32.mxu1 %vm4144_vm8, %v4145_v36  ;;  %v3907_v30 = vpack.c.bf16 %v1614_v29, %v1613_v26  ;;  %v1618_v35 = vld [vmem:[%s4351_s27 + $0x78] sm:$0xff]  ;;  %v3459_v59 = vld [vmem:[%s4346_s24 + $0x3] ss:$0 sm:$0xff]  ;;  %v3464_v7 = vld [vmem:[%s4356_s4] ss:$0 sm:$0xff]  ;;  %s4878_s27 = sld [smem:[#allocation34_spill]] }
  0x95   : > { %3860 = vmatpush3.bf16.msra.mxu0 %v3859_v50  ;;  %v3913_v37 = vpack.c.bf16 %v1618_v35, %v1617_v34  ;;  %v3448_v50 = vld [vmem:[%s4877_s13] ss:$0 sm:$0xff]  ;;  %v3451_v2 = vld [vmem:[%s4877_s13 + $0x3] ss:$0 sm:$0xff] }
  0x96   : > { %3866 = vmatpush3.bf16.msra.mxu1 %v3865_v51  ;;  %3867 = vmatprep.subr.bf16.mxu0 %v4143_v28 }
  0x97   : > { %3873 = vmatprep.subr.bf16.mxu1 %v4143_v28 }
  0x98   : > { %3652 = vmatmul.mubr.msk.f32.vlgmr.msra.gmra.mrb[2].mxu0 %vm995_vm9, %v4478_v43 }
  0x99   : > { %3663 = vmatmul.mubr.msk.f32.vlgmr.msra.gmra.mrb[2].mxu1 %vm995_vm9, %v4478_v43  ;;  %3869 = vmatpush3.bf16.msra.mxu0 %v3868_v56 }
  0x9a   : > { %3875 = vmatpush3.bf16.msra.mxu1 %v3874_v57  ;;  %3870 = vmatprep.subr.bf16.mxu0 %v4143_v28  ;;  %v3449_v57 = vld [vmem:[%s4877_s13 + $0x1] ss:$0 sm:$0xff] }
  0x9b   : > { %3876 = vmatprep.subr.bf16.mxu1 %v4143_v28  ;;  %3673 = vmatprep.mubr.msk.f32.mxu0 %vm4144_vm8, %v4145_v36 }
  0x9c   : > { %3684 = vmatprep.mubr.msk.f32.mxu1 %vm4144_vm8, %v4145_v36 }
  0x9d   : > { %3872 = vmatpush3.bf16.msra.mxu0 %v3871_v62  ;;  %v3450_v62 = vld [vmem:[%s4877_s13 + $0x2] ss:$0 sm:$0xff] }
  0x9e   : > { %3878 = vmatpush3.bf16.msra.mxu1 %v3877_v63  ;;  %3879 = vmatprep.subr.bf16.mxu0 %v4143_v28 }
  0x9f   : > { %3885 = vmatprep.subr.bf16.mxu1 %v4143_v28 }
  0xa0   : > { %3674 = vmatmul.mubr.msk.f32.vlgmr.msra.gmra.mrb[4].mxu0 %vm995_vm9, %v4478_v43 }
  0xa1   : > { %3685 = vmatmul.mubr.msk.f32.vlgmr.msra.gmra.mrb[4].mxu1 %vm995_vm9, %v4478_v43  ;;  %3881 = vmatpush3.bf16.msra.mxu0 %v3880_v4 }
  0xa2   : > { %3887 = vmatpush3.bf16.msra.mxu1 %v3886_v5  ;;  %3882 = vmatprep.subr.bf16.mxu0 %v4143_v28 }
  0xa3   : > { %3888 = vmatprep.subr.bf16.mxu1 %v4143_v28  ;;  %3695 = vmatprep.mubr.msk.f32.mxu0 %vm4144_vm8, %v4145_v36 }
  0xa4   : > { %3706 = vmatprep.mubr.msk.f32.mxu1 %vm4144_vm8, %v4145_v36 }
  0xa5   : > { %3884 = vmatpush3.bf16.msra.mxu0 %v3883_v10 }
  0xa6   : > { %3890 = vmatpush3.bf16.msra.mxu1 %v3889_v11  ;;  %3891 = vmatprep.subr.bf16.mxu0 %v4143_v28  ;;  %v3465_v11 = vld [vmem:[%s4356_s4 + $0x1] ss:$0 sm:$0xff] }
  0xa7   : > { %3897 = vmatprep.subr.bf16.mxu1 %v4143_v28 }
  0xa8   : > { %3696 = vmatmul.mubr.msk.f32.vlgmr.msra.gmra.mrb[6].mxu0 %vm995_vm9, %v4478_v43 }
  0xa9   : > { %3707 = vmatmul.mubr.msk.f32.vlgmr.msra.gmra.mrb[6].mxu1 %vm995_vm9, %v4478_v43  ;;  %3893 = vmatpush3.bf16.msra.mxu0 %v3892_v14 }
  0xaa   : > { %3894 = vmatprep.subr.bf16.mxu0 %v4143_v28  ;;  %3717 = vmatprep.mubr.msk.f32.mxu0 %vm4144_vm8, %v4145_v36 }
  0xab   : > { %3728 = vmatprep.mubr.msk.f32.mxu1 %vm4144_vm8, %v4145_v36  ;;  %3899 = vmatpush3.bf16.msra.mxu1 %v3898_v21 }
  0xac   : > { %3900 = vmatprep.subr.bf16.mxu1 %v4143_v28 }
  0xad   : > { %3896 = vmatpush3.bf16.msra.mxu0 %v3895_v17 }
  0xae   : > { %3903 = vmatprep.subr.bf16.mxu0 %v4143_v28 }
  0xaf   : > { %3902 = vmatpush3.bf16.msra.mxu1 %v3901_v27 }
  0xb0   : > { %3718 = vmatmul.mubr.msk.f32.vlgmr.msra.gmra.mrb[8].mxu0 %vm995_vm9, %v4478_v43  ;;  %3909 = vmatprep.subr.bf16.mxu1 %v4143_v28 }
  0xb1   : > { %3905 = vmatpush3.bf16.msra.mxu0 %v3904_v23  ;;  %3739 = vmatprep.mubr.msk.f32.mxu0 %vm4144_vm8, %v4145_v36 }
  0xb2   : > { %3906 = vmatprep.subr.bf16.mxu0 %v4143_v28  ;;  %3729 = vmatmul.mubr.msk.f32.vlgmr.msra.gmra.mrb[8].mxu1 %vm995_vm9, %v4478_v43 }
  0xb3   : > { %3911 = vmatpush3.bf16.msra.mxu1 %v3910_v33  ;;  %3750 = vmatprep.mubr.msk.f32.mxu1 %vm4144_vm8, %v4145_v36 }
  0xb4   : > { %3912 = vmatprep.subr.bf16.mxu1 %v4143_v28 }
  0xb5   : > { %3908 = vmatpush3.bf16.msra.mxu0 %v3907_v30 }
  0xb6   : > { %3753 = vmatprep.subr.mxu0 %v4145_v36 }
  0xb7   : > { %3914 = vmatpush3.bf16.msra.mxu1 %v3913_v37 }
  0xb8   : > { %3740 = vmatmul.mubr.msk.f32.vlgmr.msra.gmra.mrb[10].mxu0 %vm995_vm9, %v4478_v43  ;;  %3768 = vmatprep.subr.mxu1 %v4145_v36 }
  0xb9   : > { %3755 = vmatprep.mubr.msk.f32.mxu0 %vm4144_vm8, %v4145_v36 }
  0xba   : > { %3751 = vmatmul.mubr.msk.f32.vlgmr.msra.gmra.mrb[10].mxu1 %vm995_vm9, %v4478_v43 }
  0xbb   : > { %3770 = vmatprep.mubr.msk.f32.mxu1 %vm4144_vm8, %v4145_v36 }
 0x163   : > { %v1065_v38 = vpop.f32.mrb[0].mxu0 }
 0x164   : > { %v3631_v39 = vpop.f32.mrb[1].mxu0  ;;  %v1135_v40 = vpop.f32.mrb[0].mxu1  ;;  %v1066_v56 = vadd.f32 %v3448_v50, %v1065_v38 }
 0x165   : > { %v3642_v41 = vpop.f32.mrb[1].mxu1  ;;  %v1136_v60 = vadd.f32 %v3449_v57, %v1135_v40 }
 0x16b   : > { %v1205_v42 = vpop.f32.mrb[2].mxu0 }
 0x16c   : > { %v3653_v44 = vpop.f32.mrb[3].mxu0  ;;  %v1275_v45 = vpop.f32.mrb[2].mxu1  ;;  %v1206_v5 = vadd.f32 %v3450_v62, %v1205_v42 }
 0x16d   : > { %v3664_v46 = vpop.f32.mrb[3].mxu1  ;;  %v1276_v6 = vadd.f32 %v3451_v2, %v1275_v45  ;;  %v3467_v2 = vld [vmem:[%s4356_s4 + $0x3] ss:$0 sm:$0xff] }
 0x173   : > { %v1389_v48 = vpop.f32.mrb[4].mxu0 }
 0x174   : > { %v1390_v51 = vadd.f32 %v3456_v47, %v1389_v48  ;;  %v3675_v52 = vpop.f32.mrb[5].mxu0  ;;  %v1459_v53 = vpop.f32.mrb[4].mxu1 }
 0x175   : > { %v3686_v54 = vpop.f32.mrb[5].mxu1  ;;  %v1460_v55 = vadd.f32 %v3457_v49, %v1459_v53 }
 0x176   : > { %3754 = vmatpush3.xpose.msk.msra.mxu0 %vm1927_vm10, %v1390_v51 }
 0x177   : > { %3758 = vmatprep.subr.mxu0 %v4145_v36 }
 0x179   : > { %3756 = vmatmul.mubr.msk.f32.vlgmr.msra.gmra.mrb[12].mxu0 %vm1927_vm10, %v1066_v56 }
 0x17a   : > { %3759 = vmatpush3.xpose.msk.msra.mxu0 %vm1927_vm10, %v1460_v55  ;;  %3760 = vmatprep.mubr.msk.f32.mxu0 %vm4144_vm8, %v4145_v36 }
 0x17b   : > { %v1529_v61 = vpop.f32.mrb[6].mxu0  ;;  %3763 = vmatprep.subr.mxu0 %v4145_v36 }
 0x17c   : > { %v1530_v63 = vadd.f32 %v3458_v58, %v1529_v61  ;;  %v1599_v0 = vpop.f32.mrb[6].mxu1  ;;  %v3697_v1 = vpop.f32.mrb[7].mxu0  ;;  %v3466_v61 = vld [vmem:[%s4356_s4 + $0x2] ss:$0 sm:$0xff]  ;;  %s4887_s4 = scalar_lea.vmem %s4808_s17, %s4324_s3 }
 0x17d   : > { %v1600_v3 = vadd.f32 %v3459_v59, %v1599_v0  ;;  %3761 = vmatmul.mubr.msk.f32.vlgmr.msra.gmra.mrb[14].mxu0 %vm1927_vm10, %v1136_v60  ;;  %v3708_v4 = vpop.f32.mrb[7].mxu1 }
 0x17e   : > { %3764 = vmatpush3.xpose.msk.msra.mxu0 %vm1927_vm10, %v1530_v63  ;;  %3765 = vmatprep.mubr.msk.f32.mxu0 %vm4144_vm8, %v4145_v36 }
 0x17f   : > { %3769 = vmatpush3.xpose.msk.msra.mxu1 %vm1927_vm10, %v1600_v3  ;;  %3773 = vmatprep.subr.mxu0 %v4145_v36 }
 0x180   : > { %3778 = vmatprep.subr.mxu1 %v4145_v36 }
 0x181   : > { %3766 = vmatmul.mubr.msk.f32.vlgmr.msra.gmra.mrb[16].mxu0 %vm1927_vm10, %v1206_v5 }
 0x182   : > { %3771 = vmatmul.mubr.msk.f32.vlgmr.msra.gmra.mrb[12].mxu1 %vm1927_vm10, %v1276_v6  ;;  %3775 = vmatprep.mubr.msk.f32.mxu0 %vm4144_vm8, %v4145_v36 }
 0x183   : > { %3780 = vmatprep.mubr.msk.f32.mxu1 %vm4144_vm8, %v4145_v36  ;;  %v1713_v8 = vpop.f32.mrb[8].mxu0 }
 0x184   : > { %v1714_v9 = vadd.f32 %v3464_v7, %v1713_v8  ;;  %v3719_v10 = vpop.f32.mrb[9].mxu0 }
 0x185   : > { %v1783_v12 = vpop.f32.mrb[8].mxu1  ;;  %v2572_v10 = vld [vmem:[%s4366_s2] sm:$0xff] }
 0x186   : > { %3774 = vmatpush3.msra.mxu0 %v1714_v9  ;;  %v1784_v13 = vadd.f32 %v3465_v11, %v1783_v12  ;;  %v3730_v14 = vpop.f32.mrb[9].mxu1  ;;  %v2573_v11 = vld [vmem:[%s4366_s2 + $0x8] sm:$0xff]  ;;  %v2574_v12 = vld [vmem:[%s4366_s2 + $0x10] sm:$0xff] }
 0x187   : > { %3783 = vmatprep.subr.mxu0 %v4145_v36 }
 0x188   : > { %3779 = vmatpush3.msra.mxu1 %v1784_v13 }
 0x189   : > { %3788 = vmatprep.subr.mxu1 %v4145_v36 }
 0x18b   : > { %v4617_v15 = vpop.f32.mrb[10].mxu0 }
 0x18c   : > { %v3741_v16 = vpop.f32.mrb[11].mxu0  ;;  %v1854_v1 = vadd.f32 %v3466_v61, %v4617_v15  ;;  %v2575_v15 = vld [vmem:[%s4366_s2 + $0x18] sm:$0xff]  ;;  %s4879_s2 = scalar_lea.vmem %s4878_s27, %s4324_s3 }
 0x18d   : > { %v4620_v17 = vpop.f32.mrb[10].mxu1 }
 0x18e   : > { %v3752_v18 = vpop.f32.mrb[11].mxu1  ;;  %v1924_v5 = vadd.f32 %v3467_v2, %v4620_v17 }
 0x24c   : > { %v2000_v19 = vpop.f32.mrb[12].mxu0 }
 0x24d   : > { %v2232_v20 = vmul.f32 0.35355338, %v2000_v19  ;;  %v3757_v21 = vpop.f32.mrb[13].mxu0 }
 0x24f   : > { %v2236_v22 = vsel %vm1927_vm10, %v2232_v20, -inf }
 0x250   : > { %2237 = vmax.xlane.f32.xlu0 %v2236_v22  ;;  %v2076_v23 = vpop.f32.mrb[14].mxu0 }
 0x251   : > { %v2233_v24 = vmul.f32 0.35355338, %v2076_v23  ;;  %v3762_v25 = vpop.f32.mrb[15].mxu0 }
 0x253   : > { %v2239_v26 = vsel %vm1927_vm10, %v2233_v24, -inf }
 0x254   : > { %2240 = vmax.xlane.f32.xlu0 %v2239_v26  ;;  %v2152_v27 = vpop.f32.mrb[16].mxu0 }
 0x255   : > { %v2228_v29 = vpop.f32.mrb[12].mxu1  ;;  %v2234_v30 = vmul.f32 0.35355338, %v2152_v27  ;;  %v3767_v31 = vpop.f32.mrb[17].mxu0 }
 0x256   : > { %v3772_v32 = vpop.f32.mrb[13].mxu1  ;;  %v2235_v33 = vmul.f32 0.35355338, %v2228_v29 }
 0x257   : > { %v2242_v34 = vsel %vm1927_vm10, %v2234_v30, -inf }
 0x258   : > { %2243 = vmax.xlane.f32.xlu1 %v2242_v34  ;;  %v2245_v35 = vsel %vm1927_vm10, %v2235_v33, -inf }
 0x25c   : > { %2246 = vmax.xlane.f32.xlu1 %v2245_v35 }
 0x2dd   : > { %v2238_v37 = vpop.xlane.xlu0 %2237 }
 0x2de   : > { %v2248_v38 = vsub.f32 %v2232_v20, %v2238_v37 }
 0x2e0   : > { %v2252_v39 = vmul.f32 1.442695, %v2248_v38 }
 0x2e1   : > { %v2241_v40 = vpop.xlane.xlu0 %2240 }
 0x2e2   : > { %4008 = vpow2.f32 %v2252_v39  ;;  %v2249_v41 = vsub.f32 %v2233_v24, %v2241_v40 }
 0x2e4   : > { %v2254_v42 = vmul.f32 1.442695, %v2249_v41 }
 0x2e5   : > { %v2244_v44 = vpop.xlane.xlu1 %2243 }
 0x2e6   : > { %4010 = vpow2.f32 %v2254_v42  ;;  %v2250_v45 = vsub.f32 %v2234_v30, %v2244_v44 }
 0x2e8   : > { %v2256_v46 = vmul.f32 1.442695, %v2250_v45 }
 0x2e9   : > { %v2247_v47 = vpop.xlane.xlu1 %2246 }
 0x2ea   : > { %4012 = vpow2.f32 %v2256_v46  ;;  %v2251_v48 = vsub.f32 %v2235_v33, %v2247_v47 }
 0x2ec   : > { %v4009_v49 = vpop.eup %4008  ;;  %v2258_v50 = vmul.f32 1.442695, %v2251_v48  ;;  %v2922_v48 = vld [vmem:[%s4379_s8] sm:$0xff] }
 0x2ed   : > { %v2260_v51 = vsel %vm1927_vm10, %v4009_v49, 0.0 }
 0x2ee   : > { %4014 = vpow2.f32 %v2258_v50  ;;  %2261 = vadd.xlane.f32.xlu0 %v2260_v51  ;;  %v2924_v50 = vld [vmem:[%s4379_s8 + $0x10] sm:$0xff]  ;;  %v2925_v51 = vld [vmem:[%s4379_s8 + $0x18] sm:$0xff] }
 0x2f0   : > { %v4011_v52 = vpop.eup %4010 }
 0x2f1   : > { %v2263_v53 = vsel %vm1927_vm10, %v4011_v52, 0.0 }
 0x2f2   : > { %2264 = vadd.xlane.f32.xlu1 %v2263_v53  ;;  %v3007_v53 = vld [vmem:[%s4389_s10] sm:$0xff] }
 0x2f4   : > { %v4013_v54 = vpop.eup %4012 }
 0x2f5   : > { %v2266_v55 = vsel %vm1927_vm10, %v4013_v54, 0.0 }
 0x2f6   : > { %2267 = vadd.xlane.f32.xlu0 %v2266_v55  ;;  %v3009_v55 = vld [vmem:[%s4389_s10 + $0x10] sm:$0xff] }
 0x2f8   : > { %v4015_v56 = vpop.eup %4014 }
 0x2f9   : > { %v2269_v57 = vsel %vm1927_vm10, %v4015_v56, 0.0 }
 0x2fa   : > { %2270 = vadd.xlane.f32.xlu1 %v2269_v57  ;;  %v3010_v57 = vld [vmem:[%s4389_s10 + $0x18] sm:$0xff] }
 0x37b   : > { %v2262_v58 = vpop.xlane.xlu0 %2261 }
 0x37c   : > { %4016 = vrcp.f32 %v2262_v58  ;;  %v3925_v58 = vpack.c.bf16 %v3010_v57, %v3009_v55 }
 0x37f   : > { %v2265_v59 = vpop.xlane.xlu1 %2264 }
 0x380   : > { %4018 = vrcp.f32 %v2265_v59  ;;  %v3011_v59 = vld [vmem:[%s4389_s10 + $0x20] sm:$0xff] }
 0x383   : > { %v2268_v60 = vpop.xlane.xlu0 %2267 }
 0x384   : > { %4020 = vrcp.f32 %v2268_v60  ;;  %v3012_v60 = vld [vmem:[%s4389_s10 + $0x28] sm:$0xff] }
 0x385   : > { %v3928_v61 = vpack.c.bf16 %v3012_v60, %v3011_v59 }
 0x386   : > { %v4017_v62 = vpop.eup %4016 }
 0x387   : > { %v2276_v63 = vmul.f32 %v4017_v62, %v4009_v49  ;;  %v2271_v0 = vpop.xlane.xlu1 %2270  ;;  %v2923_v49 = vld [vmem:[%s4379_s8 + $0x8] sm:$0xff] }
 0x388   : > { %4022 = vrcp.f32 %v2271_v0 }
 0x389   : > { %3776 = vmatmul.mubr.msk.f32.vlgmr.msra.gmra.mrb[18].mxu0 %vm1927_vm10, %v2276_v63 }
 0x38a   : > { %v4019_v3 = vpop.eup %4018  ;;  %3784 = vmatpush3.msra.mxu0 %v1854_v1  ;;  %3785 = vmatprep.mubr.msk.f32.mxu0 %vm4144_vm8, %v4145_v36 }
 0x38b   : > { %v2277_v4 = vmul.f32 %v4019_v3, %v4011_v52  ;;  %3793 = vmatprep.subr.mxu0 %v4145_v36  ;;  %v3919_v52 = vpack.c.bf16 %v2925_v51, %v2924_v50 }
 0x38d   : > { %3781 = vmatmul.mubr.msk.f32.vlgmr.msra.gmra.mrb[14].mxu1 %vm1927_vm10, %v2277_v4 }
 0x38e   : > { %v4021_v6 = vpop.eup %4020  ;;  %3789 = vmatpush3.msra.mxu1 %v1924_v5  ;;  %3790 = vmatprep.mubr.msk.f32.mxu1 %vm4144_vm8, %v4145_v36 }
 0x38f   : > { %v2278_v7 = vmul.f32 %v4021_v6, %v4013_v54  ;;  %3798 = vmatprep.subr.mxu1 %v4145_v36  ;;  %v3008_v54 = vld [vmem:[%s4389_s10 + $0x8] sm:$0xff] }
 0x391   : > { %3786 = vmatmul.mubr.msk.f32.vlgmr.msra.gmra.mrb[20].mxu0 %vm1927_vm10, %v2278_v7 }
 0x392   : > { %v4023_v8 = vpop.eup %4022  ;;  %3795 = vmatprep.mubr.msk.f32.mxu0 %vm4144_vm8, %v4145_v36  ;;  %3794 = vmatpush3.msra.mxu0 %v2572_v10 }
 0x393   : > { %v2279_v9 = vmul.f32 %v4023_v8, %v4015_v56  ;;  %3803 = vmatprep.subr.mxu0 %v4145_v36  ;;  %v3922_v56 = vpack.c.bf16 %v3008_v54, %v3007_v53  ;;  %v3490_v8 = vld [vmem:[%s4881_s9] ss:$0 sm:$0xff]  ;;  %s4890_s9 = smov %s4889_s23 }
 0x395   : > { %3791 = vmatmul.mubr.msk.f32.vlgmr.msra.gmra.mrb[16].mxu1 %vm1927_vm10, %v2279_v9 }
 0x396   : > { %3800 = vmatprep.mubr.msk.f32.mxu1 %vm4144_vm8, %v4145_v36  ;;  %3799 = vmatpush3.msra.mxu1 %v2573_v11  ;;  %v3013_v11 = vld [vmem:[%s4389_s10 + $0x30] sm:$0xff] }
 0x397   : > { %3808 = vmatprep.subr.mxu1 %v4145_v36 }
 0x45c   : > { %v2349_v13 = vpop.f32.mrb[18].mxu0 }
 0x45d   : > { %v3777_v14 = vpop.f32.mrb[19].mxu0  ;;  %3796 = vmatmul.mubr.msk.f32.vlgmr.msra.gmra.mrb[22].mxu0 %vm1927_vm10, %v2349_v13 }
 0x45e   : > { %3804 = vmatpush3.msra.mxu0 %v2574_v12  ;;  %3805 = vmatprep.mubr.msk.f32.mxu0 %vm4144_vm8, %v4145_v36  ;;  %v3014_v12 = vld [vmem:[%s4389_s10 + $0x38] sm:$0xff]  ;;  %v3491_v14 = vld [vmem:[%s4882_s6] ss:$0 sm:$0xff]  ;;  %s4884_s10 = sld [smem:[#allocation12_spill]]  ;;  %s3135_s6 = scalar_lea.sflag [#allocation5], %s4891_s25 }
 0x45f   : > { %3915 = vmatprep.subr.bf16.mxu0 %v4143_v28  ;;  %v3931_v13 = vpack.c.bf16 %v3014_v12, %v3013_v11 }
 0x460   : > { %v2422_v16 = vpop.f32.mrb[14].mxu1 }
 0x461   : > { %v3782_v17 = vpop.f32.mrb[15].mxu1  ;;  %3801 = vmatmul.mubr.msk.f32.vlgmr.msra.gmra.mrb[18].mxu1 %vm1927_vm10, %v2422_v16 }
 0x462   : > { %3809 = vmatpush3.msra.mxu1 %v2575_v15  ;;  %3810 = vmatprep.mubr.msk.f32.mxu1 %vm4144_vm8, %v4145_v36 }
 0x463   : > { %3921 = vmatprep.subr.bf16.mxu1 %v4143_v28 }
 0x464   : > { %v2495_v18 = vpop.f32.mrb[20].mxu0  ;;  %s3498_s8 = sshll.u32 %s4884_s10, 7 }
 0x465   : > { %v3787_v19 = vpop.f32.mrb[21].mxu0  ;;  %3806 = vmatmul.mubr.msk.f32.vlgmr.msra.gmra.mrb[24].mxu0 %vm1927_vm10, %v2495_v18  ;;  %s4734_s20 = scalar_lea.hbm %s4889_s23, %s3498_s8 }
 0x466   : > { %3821 = vmatprep.mubr.msk.f32.mxu0 %vm4144_vm8, %v4145_v36  ;;  %v3493_v19 = vld [vmem:[%s4883_s5] ss:$0 sm:$0xff]  ;;  %s4050_s5 = scalar_lea.vmem %s4049_s1, 256 }
 0x468   : > { %v2568_v20 = vpop.f32.mrb[16].mxu1 }
 0x469   : > { %v3792_v21 = vpop.f32.mrb[17].mxu1  ;;  %3811 = vmatmul.mubr.msk.f32.vlgmr.msra.gmra.mrb[20].mxu1 %vm1927_vm10, %v2568_v20 }
 0x46a   : > { %3840 = vmatprep.mubr.msk.f32.mxu1 %vm4144_vm8, %v4145_v36  ;;  %v3488_v36 = vld [vmem:[%s4879_s2] ss:$0 sm:$0xff]  ;;  %3923 = vmatpush3.bf16.msra.mxu1 %v3922_v56  ;;  %s4888_s2 = scalar_lea.vmem %s4809_s18, %s4324_s3  ;;  %s4044_s3 = scalar_lea.vmem %s4736_s30, 128 }
 0x46b   : > { %3924 = vmatprep.subr.bf16.mxu1 %v4143_v28  ;;  %p4045_p10 = scmp.ne.s32.totalorder %s4736_s30, %s4044_s3  ;;  %p4052_p1 = scmp.lt.s32.totalorder %s4050_s5, %s4044_s3 }
 0x46d   : > { %p4046_p11 = pnand %p4045_p10, %p4299_p8  ;;  %p4053_p2 = por %p4052_p1, %p4051_p13 }
 0x46e   : > { %3926 = vmatpush3.bf16.msra.mxu1 %v3925_v58 }
 0x46f   : > { %3927 = vmatprep.subr.bf16.mxu1 %v4143_v28  ;;  %p4047_p12 = pneg %p4046_p11 }
 0x471   : > { %p4054_p3 = pnand %p4053_p2, %p4047_p12 }
 0x472   : > { %3929 = vmatpush3.bf16.msra.mxu1 %v3928_v61 }
 0x473   : > { %3930 = vmatprep.subr.bf16.mxu1 %v4143_v28 }
 0x476   : > { %3932 = vmatpush3.bf16.msra.mxu1 %v3931_v13 }
 0x530   : > { %v2645_v22 = vpop.f32.mrb[22].mxu0 }
 0x531   : > { %v3797_v23 = vpop.f32.mrb[23].mxu0  ;;  %v2868_v25 = vsel %vm995_vm9, %v2645_v22, 0.0 }
 0x534   : > { %v2718_v24 = vpop.f32.mrb[18].mxu1 }
 0x535   : > { %v2869_v26 = vsel %vm995_vm9, %v2718_v24, 0.0  ;;  %v3802_v27 = vpop.f32.mrb[19].mxu1 }
 0x536   : > { %v2870_v29 = vadd.f32 %v2869_v26, %v2868_v25 }
 0x538   : > { %v2791_v30 = vpop.f32.mrb[24].mxu0 }
 0x539   : > { %v2871_v31 = vsel %vm995_vm9, %v2791_v30, 0.0  ;;  %v3807_v32 = vpop.f32.mrb[25].mxu0 }
 0x53a   : > { %v2872_v33 = vadd.f32 %v2871_v31, %v2870_v29 }
 0x53c   : > { %v2864_v34 = vpop.f32.mrb[20].mxu1 }
 0x53d   : > { %v2873_v35 = vsel %vm995_vm9, %v2864_v34, 0.0  ;;  %v3812_v37 = vpop.f32.mrb[21].mxu1 }
 0x53e   : > { %v2874_v38 = vadd.f32 %v2873_v35, %v2872_v33 }
 0x540   : > { %v2882_v39 = vadd.f32 %v3488_v36, %v2874_v38 }
 0x542   : > { %v2883_v40 = vadd.f32 %v2882_v39, %v4478_v43  ;;  %v3916_v43 = vpack.c.bf16 %v2923_v49, %v2922_v48  ;;  %v3495_v39 = vld [vmem:[%s4887_s4] ss:$0 sm:$0xff] }
 0x544   : > { %v2886_v41 = vsel %vm995_vm9, %v2883_v40, 0.0  ;;  %3917 = vmatpush3.bf16.msra.mxu0 %v3916_v43 }
 0x545   : > { %2887 = vadd.xlane.f32.xlu0 %v2886_v41  ;;  %3918 = vmatprep.subr.bf16.mxu0 %v4143_v28  ;;  %v3489_v28 = vld [vmem:[%s4880_s22] ss:$0 sm:$0xff] }
 0x548   : > { %3920 = vmatpush3.bf16.msra.mxu0 %v3919_v52 }
 0x5d2   : > { %v2888_v42 = vpop.xlane.xlu0 %2887 }
 0x5d3   : > { %v2890_v44 = vmul.f32 0.03125, %v2888_v42  ;;  %v3496_v42 = vld [vmem:[%s4888_s2] ss:$0 sm:$0xff] }
 0x5d5   : > { %v2891_v45 = vsub.f32 %v2883_v40, %v2890_v44 }
 0x5d7   : > { %v2892_v46 = vmul.f32 %v2891_v45, %v2891_v45  ;;  %v2911_v6 = vmul.f32 %v3489_v28, %v2891_v45 }
 0x5d9   : > { %v2893_v47 = vsel %vm995_vm9, %v2892_v46, 0.0 }
 0x5da   : > { %2894 = vadd.xlane.f32.xlu1 %v2893_v47 }
 0x667   : > { %v2895_v62 = vpop.xlane.xlu1 %2894 }
 0x668   : > { %v2897_v63 = vmul.f32 0.032258064, %v2895_v62 }
 0x66a   : > { %4024 = vrsqrt.f32 %v2897_v63  ;;  %vm2900_vm11 = vcmp.eq.f32.partialorder %v2897_v63, inf  ;;  %v2903_v2 = vand.u32 2147483648, %v2897_v63  ;;  %vm2902_vm12 = vcmp.eq.f32.partialorder %v2897_v63, 0.0 }
 0x674   : > { %v4025_v0 = vpop.eup %4024 }
 0x675   : > { %v2899_v1 = vmul.f32 %v4025_v0, %v2897_v63 }
 0x677   : > { %v2901_v3 = vsel %vm2900_vm11, %v2897_v63, %v2899_v1 }
 0x678   : > { %v2904_v4 = vsel %vm2902_vm12, %v2903_v2, %v2901_v3 }
 0x679   : > { %v2912_v5 = vadd.f32 1e-06, %v2904_v4 }
 0x67b   : > { %4026 = vrcp.f32 %v2912_v5 }
 0x685   : > { %v4027_v7 = vpop.eup %4026 }
 0x686   : > { %v2914_v9 = vmul.f32 %v4027_v7, %v2911_v6 }
 0x688   : > { %v2921_v10 = vadd.f32 %v3490_v8, %v2914_v9 }
 0x68a   : > { %3822 = vmatmul.mubr.msk.f32.vlgmr.msra.gmra.mrb[26].mxu0 %vm995_vm9, %v2921_v10 }
 0x75d   : > { %v3002_v15 = vpop.f32.mrb[26].mxu0 }
 0x75e   : > { %v3003_v16 = vadd.f32 %v3491_v14, %v3002_v15  ;;  %v3823_v17 = vpop.f32.mrb[27].mxu0 }
 0x760   : > { %v3006_v18 = vmax.f32 %v3003_v16, 0.0 }
 0x762   : > { %3841 = vmatmul.mubr.msk.f32.vlgmr.msra.gmra.mrb[22].mxu1 %vm3022_vm13, %v3006_v18 }
 0x835   : > { %v3092_v20 = vpop.f32.mrb[22].mxu1 }
 0x836   : > { %v3093_v21 = vadd.f32 %v3493_v19, %v3092_v20  ;;  %v3842_v22 = vpop.f32.mrb[23].mxu1 }
 0x838   : > { %v3096_v23 = vadd.f32 %v3093_v21, %v2921_v10 }
 0x83a   : > { %v3099_v24 = vsel %vm995_vm9, %v3096_v23, 0.0 }
 0x83b   : > { %3100 = vadd.xlane.f32.xlu0 %v3099_v24 }
 0x8c8   : > { %v3101_v25 = vpop.xlane.xlu0 %3100 }
 0x8c9   : > { %v3102_v26 = vmul.f32 0.03125, %v3101_v25 }
 0x8cb   : > { %v3103_v27 = vsub.f32 %v3096_v23, %v3102_v26 }
 0x8cd   : > { %v3104_v29 = vmul.f32 %v3103_v27, %v3103_v27  ;;  %v3122_v40 = vmul.f32 %v3495_v39, %v3103_v27 }
 0x8cf   : > { %v3105_v30 = vsel %vm995_vm9, %v3104_v29, 0.0 }
 0x8d0   : > { %3106 = vadd.xlane.f32.xlu1 %v3105_v30 }
 0x95d   : > { %v3107_v31 = vpop.xlane.xlu1 %3106 }
 0x95e   : > { %v3108_v32 = vmul.f32 0.032258064, %v3107_v31 }
 0x960   : > { %4028 = vrsqrt.f32 %v3108_v32  ;;  %vm3111_vm14 = vcmp.eq.f32.partialorder %v3108_v32, inf  ;;  %v3114_v35 = vand.u32 2147483648, %v3108_v32  ;;  %vm3113_vm15 = vcmp.eq.f32.partialorder %v3108_v32, 0.0 }
 0x96a   : > { %v4029_v33 = vpop.eup %4028 }
 0x96b   : > { %v3110_v34 = vmul.f32 %v4029_v33, %v3108_v32 }
 0x96d   : > { %v3112_v36 = vsel %vm3111_vm14, %v3108_v32, %v3110_v34 }
 0x96e   : > { %v3115_v37 = vsel %vm3113_vm15, %v3114_v35, %v3112_v36 }
 0x96f   : > { %v3123_v38 = vadd.f32 1e-06, %v3115_v37 }
 0x971   : > { %4030 = vrcp.f32 %v3123_v38 }
 0x97b   : > { %v4031_v41 = vpop.eup %4030 }
 0x97c   : > { %v3125_v44 = vmul.f32 %v4031_v41, %v3122_v40 }
 0x97e   : > { %v3132_v45 = vadd.f32 %v3496_v42, %v3125_v44 }
 0x980   : > { %3133 = vst.msk [vmem:[%s4403_s19] sm:$0xff] %vm995_vm9, %v3132_v45 }
 0x981   : > { %4057 = shalt.err (!%p4054_p3)
}
 0x982   : > { %s4058_s19 = scalar_lea.hbm %s4734_s20, 128  ;;  %s4062_s7 = scalar_lea.hbm %s4890_s9, 256 }
 0x983   : > { %p4059_p4 = scmp.ne.s32.totalorder %s4734_s20, %s4058_s19  ;;  %p4063_p7 = scmp.lt.u32.totalorder %s4734_s20, %s4890_s9 }
 0x984   : > { %p4064_p9 = scmp.lt.u32.totalorder %s4062_s7, %s4058_s19  ;;  %p4066_p11 = scmp.lt.u32.totalorder %s4058_s19, %s4734_s20 }
 0x985   : > { %p4060_p5 = pnand %p4059_p4, %p4299_p8 }
 0x986   : > { %p4065_p10 = por %p4064_p9, %p4063_p7 }
 0x987   : > { %p4061_p6 = pneg %p4060_p5 }
 0x988   : > { %p4067_p12 = por %p4066_p11, %p4065_p10 }
 0x98a   : > { %p4068_p13 = pnand %p4067_p12, %p4061_p6 }
 0x98c   : > { %4071 = shalt.err (!%p4068_p13)
}
 0x98d   : > { %3933 = dma.vmem_to_hbm [thread:$0]  (%p4299_p8), %s4736_s30, 128, %s4734_s20, %s3135_s6  }
 0x98e PF: > { %s4892_s24 = sld [smem:[#allocation15_spill]]  ;;  %s4893_s27 = sld [smem:[#allocation8_spill]] }
 0x994   : > { %p3939_p1 = scmp.ge.s32.totalorder %s4892_s24, 2  ;;  %s3160_s8 = sand.u32 1, %s4893_s27  }
 0x995   : > { %s3161_s22 = scalar_lea.sflag [#allocation5], %s3160_s8 }
 0x996   : > { %p3936_p2 = pnand %p3939_p1, %p4309_p0 }
 0x998   : > { %4107 = dma.done.wait (!%p3936_p2), %s3161_s22, 128  }
 0x999   : > { %4109 = vsyncadd (!%p3936_p2), %s3161_s22, 4294967168  ;;  %s38_s13 = sadd.s32 1, %s4892_s24   ;;  %s4895_s22 = sld [smem:[#allocation9_spill]] }
 0x99a   : > { %p35_p3 = scmp.ge.s32.totalorder %s38_s13, 6   ;;  %s4896_s2 = sld [smem:[#allocation10_spill]] }
 0x99b   : > { %s4897_s23 = sld [smem:[#allocation20_spill]]  ;;  %s4898_s24 = sld [smem:[#allocation13_spill]] }
 0x99c   : > { %s4899_s25 = sld [smem:[#allocation14_spill]]  ;;  %s4900_s3 = sld [smem:[#allocation16_spill]] }
 0x99d   : > { %s4901_s26 = sld [smem:[#allocation18_spill]]  ;;  %37 = sbr.rel (!%p35_p3) target bundleno = 32 (0x20), region = 184 }
 0x9a4   :  { %3166 = vsyncpa [#allocation5], 1 }
 0x9a5   :  { %3168 = vsyncpa [#allocation5 + $0x1], 1 }

</bundles_post_ra>
